<compile_context>
chip_gen: v6e
topology: v6e:2x2x1
jax: 0.10.0
libtpu: 0.0.40
codegen_flags: <defaults>
</compile_context>

<pallas_src>
import functools

import jax
import jax.numpy as jnp
from jax.experimental import pallas as pl
from jax.experimental.pallas import tpu as pltpu

NEG_BIG = -1e30


# ----------------------------------------------------------------------------
# Fused stage kernel: GraphConv + ReLU + Lupool + avg/max readout (per graph)
# ----------------------------------------------------------------------------
def _stage_kernel(a_ref, x_ref, m_ref, w_ref, b_ref, p_ref, wp_ref,
                  a_out_ref, x_out_ref, k_out_ref, ro_ref, *, k_keep):
    a_raw = a_ref[0]                     # (N, N) raw adjacency (self loops)
    x = x_ref[0]                         # (N, Fin)
    m = m_ref[0]                         # (N, 1) node mask
    w = w_ref[...]                       # (Fin, Fout)
    bias = b_ref[...]                    # (1, Fout)
    p = p_ref[...]                       # (Fout, 1) Lupool score vector
    wp = wp_ref[...]                     # (Fout, Fh) Lupool projection

    n = a_raw.shape[0]
    fh = wp.shape[1]

    def outer(u, v):                     # (N,1),(N,1) -> (N,N): u_i * v_j
        return jax.lax.dot_general(u, v, (((1,), (1,)), ((), ())),
                                   preferred_element_type=jnp.float32)

    # ---- symmetric normalization (DGL GraphConv norm='both') --------------
    a = a_raw * outer(m, m)                                  # mask pad rows/cols
    deg = jnp.sum(a, axis=1, keepdims=True)                  # (N, 1)
    dinv = jnp.where(deg > 0.0,
                     jax.lax.rsqrt(jnp.maximum(deg, 1e-12)), 0.0)
    a_norm = a * outer(dinv, dinv)

    # ---- GraphConv + ReLU --------------------------------------------------
    h = jnp.dot(a_norm, jnp.dot(x, w, preferred_element_type=jnp.float32),
                preferred_element_type=jnp.float32) + bias
    h = jnp.maximum(h, 0.0) * m          # padded rows carry no bias/relu leak

    # ---- Lupool scores (kept in VMEM, never round-tripped to HBM) ---------
    s = jnp.dot(h, p, preferred_element_type=jnp.float32)    # (N, 1)
    s = jnp.where(m > 0.0, s, NEG_BIG)

    # ---- top-K keep mask via pairwise ranking (no top_k / gather glue) ----
    ones = jnp.ones((n, 1), jnp.float32)
    s_cols = outer(ones, s)                                   # [i, j] = s_j
    idx_r = jax.lax.broadcasted_iota(jnp.int32, (n, n), 0)
    idx_c = jax.lax.broadcasted_iota(jnp.int32, (n, n), 1)
    beats = jnp.logical_or(s > s_cols,
                           jnp.logical_and(s == s_cols, idx_r < idx_c))
    wins = jnp.sum(beats.astype(jnp.float32), axis=1, keepdims=True)
    rank = (n - 1.0) - wins                                   # #nodes beating i
    keep = jnp.where(rank < k_keep, m, 0.0)                   # (N, 1)

    # ---- gate + halve feature width ----------------------------------------
    x_new = jnp.dot(h * jnp.tanh(s) * keep, wp,
                    preferred_element_type=jnp.float32) * keep  # (N, Fh)

    # ---- pooled graph: masking instead of gather (stays rectangular) ------
    a_out_ref[0] = a_raw * outer(keep, keep)
    x_out_ref[0] = x_new
    k_out_ref[0] = keep

    # ---- readout: single lane-dense [avg || max] slab -----------------------
    cnt = jnp.sum(keep, axis=0, keepdims=True)                # (1, 1)
    avg = jnp.sum(x_new, axis=0, keepdims=True) / jnp.maximum(cnt, 1.0)
    mx = jnp.max(jnp.where(keep > 0.0, x_new, NEG_BIG), axis=0, keepdims=True)
    mx = jnp.where(cnt > 0.0, mx, 0.0)    # all-padding graph -> 0, not -1e30
    ro_ref[0, :, 0:fh] = avg
    ro_ref[0, :, fh:2 * fh] = mx


def lugtp_stage(a_raw, x, mask, w, b, p, wp, *, k_keep):
    B, N, Fin = x.shape
    Fout = w.shape[1]
    Fh = wp.shape[1]
    kernel = functools.partial(_stage_kernel, k_keep=k_keep)
    out_shape = (
        jax.ShapeDtypeStruct((B, N, N), jnp.float32),        # pooled adjacency
        jax.ShapeDtypeStruct((B, N, Fh), jnp.float32),       # pooled features
        jax.ShapeDtypeStruct((B, N, 1), jnp.float32),        # keep mask
        jax.ShapeDtypeStruct((B, 1, 2 * Fh), jnp.float32),   # [avg || max]
    )
    return pl.pallas_call(
        kernel,
        out_shape=out_shape,
        grid=(B,),
        in_specs=[
            pl.BlockSpec((1, N, N), lambda i: (i, 0, 0)),
            pl.BlockSpec((1, N, Fin), lambda i: (i, 0, 0)),
            pl.BlockSpec((1, N, 1), lambda i: (i, 0, 0)),
            pl.BlockSpec((Fin, Fout), lambda i: (0, 0)),
            pl.BlockSpec((1, Fout), lambda i: (0, 0)),
            pl.BlockSpec((Fout, 1), lambda i: (0, 0)),
            pl.BlockSpec((Fout, Fh), lambda i: (0, 0)),
        ],
        out_specs=(
            pl.BlockSpec((1, N, N), lambda i: (i, 0, 0)),
            pl.BlockSpec((1, N, Fh), lambda i: (i, 0, 0)),
            pl.BlockSpec((1, N, 1), lambda i: (i, 0, 0)),
            pl.BlockSpec((1, 1, 2 * Fh), lambda i: (i, 0, 0)),
        ),
        compiler_params=pltpu.CompilerParams(
            dimension_semantics=("parallel",)),      # 2 TCs on v7x, no-op v5e/v6e
    )(a_raw, x, mask, w, b.reshape(1, Fout), p, wp)


# ----------------------------------------------------------------------------
# Final head: the three readout projections/adds collapsed into one kernel
# ----------------------------------------------------------------------------
def _head_kernel(r1_ref, r2_ref, r3_ref, wa_ref, ba_ref, wb_ref, bb_ref, o_ref):
    p1 = jnp.dot(r1_ref[...], wa_ref[...],
                 preferred_element_type=jnp.float32) + ba_ref[...]
    p2 = jnp.dot(r2_ref[...], wb_ref[...],
                 preferred_element_type=jnp.float32) + bb_ref[...]
    o_ref[...] = p1 + p2 + r3_ref[...]


def final_head(r1, r2, r3, wa, ba, wb, bb):
    B = r1.shape[0]
    E = wa.shape[1]
    vmem = pl.BlockSpec(memory_space=pltpu.MemorySpace.VMEM)
    return pl.pallas_call(
        _head_kernel,
        out_shape=jax.ShapeDtypeStruct((B, E), jnp.float32),
        in_specs=[vmem] * 7,
        out_specs=vmem,
    )(r1, r2, r3, wa, ba.reshape(1, E), wb, bb.reshape(1, E))


# ----------------------------------------------------------------------------
# LuGTP forward
# ----------------------------------------------------------------------------
def lugtp_forward(params, a_raw, x_feat, mask, pad_dmap=None):
    # pad_dmap is accepted but unused, matching the reference forward.
    del pad_dmap
    B, N, _ = a_raw.shape

    a1, x1, m1, r1 = lugtp_stage(a_raw, x_feat, mask,
                                 params["gconv1_w"], params["gconv1_b"],
                                 params["lupool1_p"], params["lupool1_w"],
                                 k_keep=N // 2)
    a2, x2, m2, r2 = lugtp_stage(a1, x1, m1,
                                 params["gconv2_w"], params["gconv2_b"],
                                 params["lupool2_p"], params["lupool2_w"],
                                 k_keep=N // 4)
    _, _, _, r3 = lugtp_stage(a2, x2, m2,
                              params["gconv3_w"], params["gconv3_b"],
                              params["lupool3_p"], params["lupool3_w"],
                              k_keep=N // 8)

    # TODO(synk): the reference forward computes readout1 + readout2 + readout3
    # with mismatched widths (hidd, hidd/2, hidd/4); the otherwise-unused
    # catlay512/catlay256 GraphConvs are clearly meant to project readout1/2
    # down to hidd/4 first, so they are applied here (readouts carry no graph).
    out = final_head(r1[:, 0, :], r2[:, 0, :], r3[:, 0, :],
                     params["cat_a_w"], params["cat_a_b"],
                     params["cat_b_w"], params["cat_b_b"])
    return out


# ----------------------------------------------------------------------------
# Deterministic parameter init + example run
# ----------------------------------------------------------------------------
def init_params(key, inputfeature, hiddsize):
    def glorot(k, shape):
        scale = jnp.sqrt(2.0 / (shape[0] + shape[-1]))
        return scale * jax.random.normal(k, shape, dtype=jnp.float32)

    h, h2, h4, h8 = hiddsize, hiddsize // 2, hiddsize // 4, hiddsize // 8
    ks = jax.random.split(key, 12)
    return {
        "gconv1_w": glorot(ks[0], (inputfeature, h)),
        "gconv1_b": jnp.zeros((h,), jnp.float32),
        "lupool1_p": glorot(ks[1], (h, 1)),
        "lupool1_w": glorot(ks[2], (h, h2)),
        "gconv2_w": glorot(ks[3], (h2, h2)),
        "gconv2_b": jnp.zeros((h2,), jnp.float32),
        "lupool2_p": glorot(ks[4], (h2, 1)),
        "lupool2_w": glorot(ks[5], (h2, h4)),
        "gconv3_w": glorot(ks[6], (h4, h4)),
        "gconv3_b": jnp.zeros((h4,), jnp.float32),
        "lupool3_p": glorot(ks[7], (h4, 1)),
        "lupool3_w": glorot(ks[8], (h4, h8)),
        # catlay512 / catlay256 analogues: (2*h2 -> h4), (2*h4 -> h4)
        "cat_a_w": glorot(ks[9], (h, h4)),
        "cat_a_b": jnp.zeros((h4,), jnp.float32),
        "cat_b_w": glorot(ks[10], (h2, h4)),
        "cat_b_b": jnp.zeros((h4,), jnp.float32),
    }


if __name__ == "__main__":
    B, N = 2, 16
    inputfeature, hiddsize = 16, 32

    root = jax.random.PRNGKey(0)
    k_par, k_adj, k_feat = jax.random.split(root, 3)

    params = init_params(k_par, inputfeature, hiddsize)

    # synthetic batched graph: symmetric 0/1 adjacency with self loops
    rand_a = jax.random.uniform(k_adj, (B, N, N))
    adj = (rand_a + jnp.swapaxes(rand_a, 1, 2) > 1.0).astype(jnp.float32)
    adj = jnp.maximum(adj, jnp.eye(N, dtype=jnp.float32)[None])     # self loops
    feat = jax.random.normal(k_feat, (B, N, inputfeature), dtype=jnp.float32)
    mask = jnp.ones((B, N, 1), dtype=jnp.float32)
    pad_dmap = jnp.zeros((B, N, N), dtype=jnp.float32)              # unused, as in reference

    fwd = jax.jit(lugtp_forward)
    out = fwd(params, adj, feat, mask, pad_dmap)
    jax.block_until_ready(out)
    assert out.shape == (B, hiddsize // 4)
    print("KERNEL_OK")
</pallas_src>

<mosaic_0001>
module attributes {stable_mosaic.version = 11 : i64} {
  func.func @_stage_kernel(%arg0: i32, %arg1: memref<1x16x16xf32, #tpu.memory_space<vmem>>, %arg2: memref<1x16x16xf32, #tpu.memory_space<vmem>>, %arg3: memref<1x16x1xf32, #tpu.memory_space<vmem>>, %arg4: memref<16x32xf32, #tpu.memory_space<vmem>>, %arg5: memref<1x32xf32, #tpu.memory_space<vmem>>, %arg6: memref<32x1xf32, #tpu.memory_space<vmem>>, %arg7: memref<32x16xf32, #tpu.memory_space<vmem>>, %arg8: memref<1x16x16xf32, #tpu.memory_space<vmem>>, %arg9: memref<1x16x16xf32, #tpu.memory_space<vmem>>, %arg10: memref<1x16x1xf32, #tpu.memory_space<vmem>>, %arg11: memref<1x1x32xf32, #tpu.memory_space<vmem>>) attributes {dimension_semantics = [#tpu.dimension_semantics<parallel>], iteration_bounds = array<i64: 2>, scalar_prefetch = 0 : i64, scratch_operands = 0 : i64, tpu.core_type = #tpu.core_type<tc>, window_params = [{transform_indices = @transform_0, window_bounds = array<i64: 1, 16, 16>}, {transform_indices = @transform_1, window_bounds = array<i64: 1, 16, 16>}, {transform_indices = @transform_2, window_bounds = array<i64: 1, 16, 1>}, {pipeline_mode = #tpu.pipeline_mode<synchronous>, transform_indices = @transform_3, window_bounds = array<i64: 16, 32>}, {pipeline_mode = #tpu.pipeline_mode<synchronous>, transform_indices = @transform_4, window_bounds = array<i64: 1, 32>}, {pipeline_mode = #tpu.pipeline_mode<synchronous>, transform_indices = @transform_5, window_bounds = array<i64: 32, 1>}, {pipeline_mode = #tpu.pipeline_mode<synchronous>, transform_indices = @transform_6, window_bounds = array<i64: 32, 16>}, {transform_indices = @transform_7, window_bounds = array<i64: 1, 16, 16>}, {transform_indices = @transform_8, window_bounds = array<i64: 1, 16, 16>}, {transform_indices = @transform_9, window_bounds = array<i64: 1, 16, 1>}, {transform_indices = @transform_10, window_bounds = array<i64: 1, 1, 32>}]} {
    %c0 = arith.constant 0 : index
    %c0_0 = arith.constant 0 : index
    %c0_1 = arith.constant 0 : index
    %0 = vector.load %arg1[%c0, %c0_0, %c0_1] : memref<1x16x16xf32, #tpu.memory_space<vmem>>, vector<1x16x16xf32>
    %1 = vector.shape_cast %0 : vector<1x16x16xf32> to vector<16x16xf32>
    %c0_2 = arith.constant 0 : index
    %c0_3 = arith.constant 0 : index
    %c0_4 = arith.constant 0 : index
    %2 = vector.load %arg2[%c0_2, %c0_3, %c0_4] : memref<1x16x16xf32, #tpu.memory_space<vmem>>, vector<1x16x16xf32>
    %3 = vector.shape_cast %2 : vector<1x16x16xf32> to vector<16x16xf32>
    %c0_5 = arith.constant 0 : index
    %c0_6 = arith.constant 0 : index
    %c0_7 = arith.constant 0 : index
    %4 = vector.load %arg3[%c0_5, %c0_6, %c0_7] : memref<1x16x1xf32, #tpu.memory_space<vmem>>, vector<1x16x1xf32>
    %5 = vector.shape_cast %4 : vector<1x16x1xf32> to vector<16x1xf32>
    %c0_8 = arith.constant 0 : index
    %c0_9 = arith.constant 0 : index
    %6 = vector.load %arg4[%c0_8, %c0_9] : memref<16x32xf32, #tpu.memory_space<vmem>>, vector<16x32xf32>
    %c0_10 = arith.constant 0 : index
    %c0_11 = arith.constant 0 : index
    %7 = vector.load %arg5[%c0_10, %c0_11] : memref<1x32xf32, #tpu.memory_space<vmem>>, vector<1x32xf32>
    %c0_12 = arith.constant 0 : index
    %c0_13 = arith.constant 0 : index
    %8 = vector.load %arg6[%c0_12, %c0_13] : memref<32x1xf32, #tpu.memory_space<vmem>>, vector<32x1xf32>
    %c0_14 = arith.constant 0 : index
    %c0_15 = arith.constant 0 : index
    %9 = vector.load %arg7[%c0_14, %c0_15] : memref<32x16xf32, #tpu.memory_space<vmem>>, vector<32x16xf32>
    %cst = arith.constant dense<0.000000e+00> : vector<16x16xf32>
    %10 = tpu.matmul %5, %5, %cst {dimension_numbers = #tpu.dot_dimension_numbers<[1], [1], [0], [0], [0, 0, 1, 0], [], []>} : vector<16x1xf32>, vector<16x1xf32>, vector<16x16xf32> -> vector<16x16xf32>
    %11 = arith.mulf %1, %10 : vector<16x16xf32>
    %cst_16 = arith.constant dense<0.000000e+00> : vector<16xf32>
    %12 = vector.multi_reduction <add>, %11, %cst_16 [1] : vector<16x16xf32> to vector<16xf32>
    %13 = vector.shape_cast %12 : vector<16xf32> to vector<16x1xf32>
    %cst_17 = arith.constant 0.000000e+00 : f32
    %14 = vector.broadcast %cst_17 : f32 to vector<16x1xf32>
    %15 = arith.cmpf ogt, %13, %14 : vector<16x1xf32>
    %cst_18 = arith.constant 9.99999996E-13 : f32
    %16 = vector.broadcast %cst_18 : f32 to vector<16x1xf32>
    %17 = arith.maximumf %13, %16 : vector<16x1xf32>
    %18 = math.rsqrt %17 : vector<16x1xf32>
    %cst_19 = arith.constant 0.000000e+00 : f32
    %19 = vector.broadcast %cst_19 : f32 to vector<16x1xf32>
    %20 = arith.select %15, %18, %19 : vector<16x1xi1>, vector<16x1xf32>
    %cst_20 = arith.constant dense<0.000000e+00> : vector<16x16xf32>
    %21 = tpu.matmul %20, %20, %cst_20 {dimension_numbers = #tpu.dot_dimension_numbers<[1], [1], [0], [0], [0, 0, 1, 0], [], []>} : vector<16x1xf32>, vector<16x1xf32>, vector<16x16xf32> -> vector<16x16xf32>
    %22 = arith.mulf %11, %21 : vector<16x16xf32>
    %cst_21 = arith.constant dense<0.000000e+00> : vector<16x32xf32>
    %23 = tpu.matmul %3, %6, %cst_21 {dimension_numbers = #tpu.dot_dimension_numbers<[1], [0], [0], [1], [0, 0, 1, 1], [], []>} : vector<16x16xf32>, vector<16x32xf32>, vector<16x32xf32> -> vector<16x32xf32>
    %cst_22 = arith.constant dense<0.000000e+00> : vector<16x32xf32>
    %24 = tpu.matmul %22, %23, %cst_22 {dimension_numbers = #tpu.dot_dimension_numbers<[1], [0], [0], [1], [0, 0, 1, 1], [], []>} : vector<16x16xf32>, vector<16x32xf32>, vector<16x32xf32> -> vector<16x32xf32>
    %25 = vector.broadcast %7 : vector<1x32xf32> to vector<16x32xf32>
    %26 = arith.addf %24, %25 : vector<16x32xf32>
    %cst_23 = arith.constant 0.000000e+00 : f32
    %27 = vector.broadcast %cst_23 : f32 to vector<16x32xf32>
    %28 = arith.maximumf %26, %27 : vector<16x32xf32>
    %29 = vector.broadcast %5 : vector<16x1xf32> to vector<16x32xf32>
    %30 = arith.mulf %28, %29 : vector<16x32xf32>
    %cst_24 = arith.constant dense<0.000000e+00> : vector<16x1xf32>
    %31 = tpu.matmul %30, %8, %cst_24 {dimension_numbers = #tpu.dot_dimension_numbers<[1], [0], [0], [1], [0, 0, 1, 1], [], []>} : vector<16x32xf32>, vector<32x1xf32>, vector<16x1xf32> -> vector<16x1xf32>
    %cst_25 = arith.constant 0.000000e+00 : f32
    %32 = vector.broadcast %cst_25 : f32 to vector<16x1xf32>
    %33 = arith.cmpf ogt, %5, %32 : vector<16x1xf32>
    %cst_26 = arith.constant -1.000000e+30 : f32
    %34 = vector.broadcast %cst_26 : f32 to vector<16x1xf32>
    %35 = arith.select %33, %31, %34 : vector<16x1xi1>, vector<16x1xf32>
    %cst_27 = arith.constant 1.000000e+00 : f32
    %36 = vector.broadcast %cst_27 : f32 to vector<16x1xf32>
    %cst_28 = arith.constant dense<0.000000e+00> : vector<16x16xf32>
    %37 = tpu.matmul %36, %35, %cst_28 {dimension_numbers = #tpu.dot_dimension_numbers<[1], [1], [0], [0], [0, 0, 1, 0], [], []>} : vector<16x1xf32>, vector<16x1xf32>, vector<16x16xf32> -> vector<16x16xf32>
    %38 = tpu.iota {dimensions = array<i32: 0>} : vector<16x16xi32>
    %39 = tpu.iota {dimensions = array<i32: 1>} : vector<16x16xi32>
    %40 = vector.broadcast %35 : vector<16x1xf32> to vector<16x16xf32>
    %41 = arith.cmpf ogt, %40, %37 : vector<16x16xf32>
    %42 = vector.broadcast %35 : vector<16x1xf32> to vector<16x16xf32>
    %43 = arith.cmpf oeq, %42, %37 : vector<16x16xf32>
    %44 = arith.cmpi slt, %38, %39 : vector<16x16xi32>
    %45 = arith.andi %43, %44 : vector<16x16xi1>
    %46 = arith.ori %41, %45 : vector<16x16xi1>
    %47 = arith.extui %46 : vector<16x16xi1> to vector<16x16xi32>
    %48 = arith.sitofp %47 : vector<16x16xi32> to vector<16x16xf32>
    %cst_29 = arith.constant dense<0.000000e+00> : vector<16xf32>
    %49 = vector.multi_reduction <add>, %48, %cst_29 [1] : vector<16x16xf32> to vector<16xf32>
    %50 = vector.shape_cast %49 : vector<16xf32> to vector<16x1xf32>
    %cst_30 = arith.constant 1.500000e+01 : f32
    %51 = vector.broadcast %cst_30 : f32 to vector<16x1xf32>
    %52 = arith.subf %51, %50 : vector<16x1xf32>
    %cst_31 = arith.constant 8.000000e+00 : f32
    %53 = vector.broadcast %cst_31 : f32 to vector<16x1xf32>
    %54 = arith.cmpf olt, %52, %53 : vector<16x1xf32>
    %cst_32 = arith.constant 0.000000e+00 : f32
    %55 = vector.broadcast %cst_32 : f32 to vector<16x1xf32>
    %56 = arith.select %54, %5, %55 : vector<16x1xi1>, vector<16x1xf32>
    %57 = math.tanh %35 : vector<16x1xf32>
    %58 = vector.broadcast %57 : vector<16x1xf32> to vector<16x32xf32>
    %59 = arith.mulf %30, %58 : vector<16x32xf32>
    %60 = vector.broadcast %56 : vector<16x1xf32> to vector<16x32xf32>
    %61 = arith.mulf %59, %60 : vector<16x32xf32>
    %cst_33 = arith.constant dense<0.000000e+00> : vector<16x16xf32>
    %62 = tpu.matmul %61, %9, %cst_33 {dimension_numbers = #tpu.dot_dimension_numbers<[1], [0], [0], [1], [0, 0, 1, 1], [], []>} : vector<16x32xf32>, vector<32x16xf32>, vector<16x16xf32> -> vector<16x16xf32>
    %63 = vector.broadcast %56 : vector<16x1xf32> to vector<16x16xf32>
    %64 = arith.mulf %62, %63 : vector<16x16xf32>
    %cst_34 = arith.constant dense<0.000000e+00> : vector<16x16xf32>
    %65 = tpu.matmul %56, %56, %cst_34 {dimension_numbers = #tpu.dot_dimension_numbers<[1], [1], [0], [0], [0, 0, 1, 0], [], []>} : vector<16x1xf32>, vector<16x1xf32>, vector<16x16xf32> -> vector<16x16xf32>
    %66 = arith.mulf %1, %65 : vector<16x16xf32>
    %c0_35 = arith.constant 0 : index
    %c0_36 = arith.constant 0 : index
    %c0_37 = arith.constant 0 : index
    %67 = vector.load %arg8[%c0_35, %c0_36, %c0_37] : memref<1x16x16xf32, #tpu.memory_space<vmem>>, vector<1x16x16xf32>
    %68 = vector.shape_cast %67 : vector<1x16x16xf32> to vector<16x16xf32>
    %69 = vector.shape_cast %66 : vector<16x16xf32> to vector<1x16x16xf32>
    tpu.vector_store %arg8[%c0_35, %c0_36, %c0_37], %69 {strides = array<i32>} : memref<1x16x16xf32, #tpu.memory_space<vmem>>, vector<1x16x16xf32>,
    %c0_38 = arith.constant 0 : index
    %c0_39 = arith.constant 0 : index
    %c0_40 = arith.constant 0 : index
    %70 = vector.load %arg9[%c0_38, %c0_39, %c0_40] : memref<1x16x16xf32, #tpu.memory_space<vmem>>, vector<1x16x16xf32>
    %71 = vector.shape_cast %70 : vector<1x16x16xf32> to vector<16x16xf32>
    %72 = vector.shape_cast %64 : vector<16x16xf32> to vector<1x16x16xf32>
    tpu.vector_store %arg9[%c0_38, %c0_39, %c0_40], %72 {strides = array<i32>} : memref<1x16x16xf32, #tpu.memory_space<vmem>>, vector<1x16x16xf32>,
    %c0_41 = arith.constant 0 : index
    %c0_42 = arith.constant 0 : index
    %c0_43 = arith.constant 0 : index
    %73 = vector.load %arg10[%c0_41, %c0_42, %c0_43] : memref<1x16x1xf32, #tpu.memory_space<vmem>>, vector<1x16x1xf32>
    %74 = vector.shape_cast %73 : vector<1x16x1xf32> to vector<16x1xf32>
    %75 = vector.shape_cast %56 : vector<16x1xf32> to vector<1x16x1xf32>
    tpu.vector_store %arg10[%c0_41, %c0_42, %c0_43], %75 {strides = array<i32>} : memref<1x16x1xf32, #tpu.memory_space<vmem>>, vector<1x16x1xf32>,
    %cst_44 = arith.constant dense<0.000000e+00> : vector<1xf32>
    %76 = vector.multi_reduction <add>, %56, %cst_44 [0] : vector<16x1xf32> to vector<1xf32>
    %77 = vector.shape_cast %76 : vector<1xf32> to vector<1x1xf32>
    %cst_45 = arith.constant dense<0.000000e+00> : vector<16xf32>
    %78 = vector.multi_reduction <add>, %64, %cst_45 [0] : vector<16x16xf32> to vector<16xf32>
    %79 = vector.shape_cast %78 : vector<16xf32> to vector<1x16xf32>
    %cst_46 = arith.constant 1.000000e+00 : f32
    %80 = vector.broadcast %cst_46 : f32 to vector<1x1xf32>
    %81 = arith.maximumf %77, %80 : vector<1x1xf32>
    %82 = vector.broadcast %81 : vector<1x1xf32> to vector<1x16xf32>
    %83 = arith.divf %79, %82 : vector<1x16xf32>
    %cst_47 = arith.constant 0.000000e+00 : f32
    %84 = vector.broadcast %cst_47 : f32 to vector<16x1xf32>
    %85 = arith.cmpf ogt, %56, %84 : vector<16x1xf32>
    %cst_48 = arith.constant -1.000000e+30 : f32
    %86 = vector.shape_cast %85 : vector<16x1xi1> to vector<16x1xi1>
    %87 = vector.broadcast %86 : vector<16x1xi1> to vector<16x16xi1>
    %88 = vector.broadcast %cst_48 : f32 to vector<16x16xf32>
    %89 = arith.select %87, %64, %88 : vector<16x16xi1>, vector<16x16xf32>
    %cst_49 = arith.constant dense<0xFF800000> : vector<16xf32>
    %90 = vector.multi_reduction <maximumf>, %89, %cst_49 [0] : vector<16x16xf32> to vector<16xf32>
    %91 = vector.shape_cast %90 : vector<16xf32> to vector<1x16xf32>
    %cst_50 = arith.constant 0.000000e+00 : f32
    %92 = vector.broadcast %cst_50 : f32 to vector<1x1xf32>
    %93 = arith.cmpf ogt, %77, %92 : vector<1x1xf32>
    %cst_51 = arith.constant 0.000000e+00 : f32
    %94 = vector.shape_cast %93 : vector<1x1xi1> to vector<1x1xi1>
    %95 = vector.broadcast %94 : vector<1x1xi1> to vector<1x16xi1>
    %96 = vector.broadcast %cst_51 : f32 to vector<1x16xf32>
    %97 = arith.select %95, %91, %96 : vector<1x16xi1>, vector<1x16xf32>
    %c0_52 = arith.constant 0 : index
    %c0_53 = arith.constant 0 : index
    %c0_54 = arith.constant 0 : index
    %98 = vector.load %arg11[%c0_52, %c0_53, %c0_54] : memref<1x1x32xf32, #tpu.memory_space<vmem>>, vector<1x1x16xf32>
    %99 = vector.shape_cast %98 : vector<1x1x16xf32> to vector<1x16xf32>
    %100 = vector.shape_cast %83 : vector<1x16xf32> to vector<1x1x16xf32>
    tpu.vector_store %arg11[%c0_52, %c0_53, %c0_54], %100 {strides = array<i32>} : memref<1x1x32xf32, #tpu.memory_space<vmem>>, vector<1x1x16xf32>,
    %c0_55 = arith.constant 0 : index
    %c0_56 = arith.constant 0 : index
    %c16 = arith.constant 16 : index
    %101 = vector.load %arg11[%c0_55, %c0_56, %c16] : memref<1x1x32xf32, #tpu.memory_space<vmem>>, vector<1x1x16xf32>
    %102 = vector.shape_cast %101 : vector<1x1x16xf32> to vector<1x16xf32>
    %103 = vector.shape_cast %97 : vector<1x16xf32> to vector<1x1x16xf32>
    tpu.vector_store %arg11[%c0_55, %c0_56, %c16], %103 {strides = array<i32>} : memref<1x1x32xf32, #tpu.memory_space<vmem>>, vector<1x1x16xf32>,
    return
  }
  func.func @transform_0(%arg0: i32) -> (i32, i32, i32) {
    %c0_i32 = arith.constant 0 : i32
    %c0_i32_0 = arith.constant 0 : i32
    %c0_i32_1 = arith.constant 0 : i32
    return %arg0, %c0_i32, %c0_i32_0 : i32, i32, i32
  }
  func.func @transform_1(%arg0: i32) -> (i32, i32, i32) {
    %c0_i32 = arith.constant 0 : i32
    %c0_i32_0 = arith.constant 0 : i32
    %c0_i32_1 = arith.constant 0 : i32
    return %arg0, %c0_i32, %c0_i32_0 : i32, i32, i32
  }
  func.func @transform_2(%arg0: i32) -> (i32, i32, i32) {
    %c0_i32 = arith.constant 0 : i32
    %c0_i32_0 = arith.constant 0 : i32
    %c0_i32_1 = arith.constant 0 : i32
    return %arg0, %c0_i32, %c0_i32_0 : i32, i32, i32
  }
  func.func @transform_3(%arg0: i32) -> (i32, i32) {
    %c0_i32 = arith.constant 0 : i32
    %c0_i32_0 = arith.constant 0 : i32
    %c0_i32_1 = arith.constant 0 : i32
    return %c0_i32, %c0_i32_0 : i32, i32
  }
  func.func @transform_4(%arg0: i32) -> (i32, i32) {
    %c0_i32 = arith.constant 0 : i32
    %c0_i32_0 = arith.constant 0 : i32
    %c0_i32_1 = arith.constant 0 : i32
    return %c0_i32, %c0_i32_0 : i32, i32
  }
  func.func @transform_5(%arg0: i32) -> (i32, i32) {
    %c0_i32 = arith.constant 0 : i32
    %c0_i32_0 = arith.constant 0 : i32
    %c0_i32_1 = arith.constant 0 : i32
    return %c0_i32, %c0_i32_0 : i32, i32
  }
  func.func @transform_6(%arg0: i32) -> (i32, i32) {
    %c0_i32 = arith.constant 0 : i32
    %c0_i32_0 = arith.constant 0 : i32
    %c0_i32_1 = arith.constant 0 : i32
    return %c0_i32, %c0_i32_0 : i32, i32
  }
  func.func @transform_7(%arg0: i32) -> (i32, i32, i32) {
    %c0_i32 = arith.constant 0 : i32
    %c0_i32_0 = arith.constant 0 : i32
    %c0_i32_1 = arith.constant 0 : i32
    return %arg0, %c0_i32, %c0_i32_0 : i32, i32, i32
  }
  func.func @transform_8(%arg0: i32) -> (i32, i32, i32) {
    %c0_i32 = arith.constant 0 : i32
    %c0_i32_0 = arith.constant 0 : i32
    %c0_i32_1 = arith.constant 0 : i32
    return %arg0, %c0_i32, %c0_i32_0 : i32, i32, i32
  }
  func.func @transform_9(%arg0: i32) -> (i32, i32, i32) {
    %c0_i32 = arith.constant 0 : i32
    %c0_i32_0 = arith.constant 0 : i32
    %c0_i32_1 = arith.constant 0 : i32
    return %arg0, %c0_i32, %c0_i32_0 : i32, i32, i32
  }
  func.func @transform_10(%arg0: i32) -> (i32, i32, i32) {
    %c0_i32 = arith.constant 0 : i32
    %c0_i32_0 = arith.constant 0 : i32
    %c0_i32_1 = arith.constant 0 : i32
    return %arg0, %c0_i32, %c0_i32_0 : i32, i32, i32
  }
}

module attributes {stable_mosaic.version = 11 : i64} {
  func.func @_stage_kernel(%arg0: i32, %arg1: memref<1x16x16xf32, #tpu.memory_space<vmem>>, %arg2: memref<1x16x16xf32, #tpu.memory_space<vmem>>, %arg3: memref<1x16x1xf32, #tpu.memory_space<vmem>>, %arg4: memref<16x16xf32, #tpu.memory_space<vmem>>, %arg5: memref<1x16xf32, #tpu.memory_space<vmem>>, %arg6: memref<16x1xf32, #tpu.memory_space<vmem>>, %arg7: memref<16x8xf32, #tpu.memory_space<vmem>>, %arg8: memref<1x16x16xf32, #tpu.memory_space<vmem>>, %arg9: memref<1x16x8xf32, #tpu.memory_space<vmem>>, %arg10: memref<1x16x1xf32, #tpu.memory_space<vmem>>, %arg11: memref<1x1x16xf32, #tpu.memory_space<vmem>>) attributes {dimension_semantics = [#tpu.dimension_semantics<parallel>], iteration_bounds = array<i64: 2>, scalar_prefetch = 0 : i64, scratch_operands = 0 : i64, tpu.core_type = #tpu.core_type<tc>, window_params = [{transform_indices = @transform_0, window_bounds = array<i64: 1, 16, 16>}, {transform_indices = @transform_1, window_bounds = array<i64: 1, 16, 16>}, {transform_indices = @transform_2, window_bounds = array<i64: 1, 16, 1>}, {pipeline_mode = #tpu.pipeline_mode<synchronous>, transform_indices = @transform_3, window_bounds = array<i64: 16, 16>}, {pipeline_mode = #tpu.pipeline_mode<synchronous>, transform_indices = @transform_4, window_bounds = array<i64: 1, 16>}, {pipeline_mode = #tpu.pipeline_mode<synchronous>, transform_indices = @transform_5, window_bounds = array<i64: 16, 1>}, {pipeline_mode = #tpu.pipeline_mode<synchronous>, transform_indices = @transform_6, window_bounds = array<i64: 16, 8>}, {transform_indices = @transform_7, window_bounds = array<i64: 1, 16, 16>}, {transform_indices = @transform_8, window_bounds = array<i64: 1, 16, 8>}, {transform_indices = @transform_9, window_bounds = array<i64: 1, 16, 1>}, {transform_indices = @transform_10, window_bounds = array<i64: 1, 1, 16>}]} {
    %c0 = arith.constant 0 : index
    %c0_0 = arith.constant 0 : index
    %c0_1 = arith.constant 0 : index
    %0 = vector.load %arg1[%c0, %c0_0, %c0_1] : memref<1x16x16xf32, #tpu.memory_space<vmem>>, vector<1x16x16xf32>
    %1 = vector.shape_cast %0 : vector<1x16x16xf32> to vector<16x16xf32>
    %c0_2 = arith.constant 0 : index
    %c0_3 = arith.constant 0 : index
    %c0_4 = arith.constant 0 : index
    %2 = vector.load %arg2[%c0_2, %c0_3, %c0_4] : memref<1x16x16xf32, #tpu.memory_space<vmem>>, vector<1x16x16xf32>
    %3 = vector.shape_cast %2 : vector<1x16x16xf32> to vector<16x16xf32>
    %c0_5 = arith.constant 0 : index
    %c0_6 = arith.constant 0 : index
    %c0_7 = arith.constant 0 : index
    %4 = vector.load %arg3[%c0_5, %c0_6, %c0_7] : memref<1x16x1xf32, #tpu.memory_space<vmem>>, vector<1x16x1xf32>
    %5 = vector.shape_cast %4 : vector<1x16x1xf32> to vector<16x1xf32>
    %c0_8 = arith.constant 0 : index
    %c0_9 = arith.constant 0 : index
    %6 = vector.load %arg4[%c0_8, %c0_9] : memref<16x16xf32, #tpu.memory_space<vmem>>, vector<16x16xf32>
    %c0_10 = arith.constant 0 : index
    %c0_11 = arith.constant 0 : index
    %7 = vector.load %arg5[%c0_10, %c0_11] : memref<1x16xf32, #tpu.memory_space<vmem>>, vector<1x16xf32>
    %c0_12 = arith.constant 0 : index
    %c0_13 = arith.constant 0 : index
    %8 = vector.load %arg6[%c0_12, %c0_13] : memref<16x1xf32, #tpu.memory_space<vmem>>, vector<16x1xf32>
    %c0_14 = arith.constant 0 : index
    %c0_15 = arith.constant 0 : index
    %9 = vector.load %arg7[%c0_14, %c0_15] : memref<16x8xf32, #tpu.memory_space<vmem>>, vector<16x8xf32>
    %cst = arith.constant dense<0.000000e+00> : vector<16x16xf32>
    %10 = tpu.matmul %5, %5, %cst {dimension_numbers = #tpu.dot_dimension_numbers<[1], [1], [0], [0], [0, 0, 1, 0], [], []>} : vector<16x1xf32>, vector<16x1xf32>, vector<16x16xf32> -> vector<16x16xf32>
    %11 = arith.mulf %1, %10 : vector<16x16xf32>
    %cst_16 = arith.constant dense<0.000000e+00> : vector<16xf32>
    %12 = vector.multi_reduction <add>, %11, %cst_16 [1] : vector<16x16xf32> to vector<16xf32>
    %13 = vector.shape_cast %12 : vector<16xf32> to vector<16x1xf32>
    %cst_17 = arith.constant 0.000000e+00 : f32
    %14 = vector.broadcast %cst_17 : f32 to vector<16x1xf32>
    %15 = arith.cmpf ogt, %13, %14 : vector<16x1xf32>
    %cst_18 = arith.constant 9.99999996E-13 : f32
    %16 = vector.broadcast %cst_18 : f32 to vector<16x1xf32>
    %17 = arith.maximumf %13, %16 : vector<16x1xf32>
    %18 = math.rsqrt %17 : vector<16x1xf32>
    %cst_19 = arith.constant 0.000000e+00 : f32
    %19 = vector.broadcast %cst_19 : f32 to vector<16x1xf32>
    %20 = arith.select %15, %18, %19 : vector<16x1xi1>, vector<16x1xf32>
    %cst_20 = arith.constant dense<0.000000e+00> : vector<16x16xf32>
    %21 = tpu.matmul %20, %20, %cst_20 {dimension_numbers = #tpu.dot_dimension_numbers<[1], [1], [0], [0], [0, 0, 1, 0], [], []>} : vector<16x1xf32>, vector<16x1xf32>, vector<16x16xf32> -> vector<16x16xf32>
    %22 = arith.mulf %11, %21 : vector<16x16xf32>
    %cst_21 = arith.constant dense<0.000000e+00> : vector<16x16xf32>
    %23 = tpu.matmul %3, %6, %cst_21 {dimension_numbers = #tpu.dot_dimension_numbers<[1], [0], [0], [1], [0, 0, 1, 1], [], []>} : vector<16x16xf32>, vector<16x16xf32>, vector<16x16xf32> -> vector<16x16xf32>
    %cst_22 = arith.constant dense<0.000000e+00> : vector<16x16xf32>
    %24 = tpu.matmul %22, %23, %cst_22 {dimension_numbers = #tpu.dot_dimension_numbers<[1], [0], [0], [1], [0, 0, 1, 1], [], []>} : vector<16x16xf32>, vector<16x16xf32>, vector<16x16xf32> -> vector<16x16xf32>
    %25 = vector.broadcast %7 : vector<1x16xf32> to vector<16x16xf32>
    %26 = arith.addf %24, %25 : vector<16x16xf32>
    %cst_23 = arith.constant 0.000000e+00 : f32
    %27 = vector.broadcast %cst_23 : f32 to vector<16x16xf32>
    %28 = arith.maximumf %26, %27 : vector<16x16xf32>
    %29 = vector.broadcast %5 : vector<16x1xf32> to vector<16x16xf32>
    %30 = arith.mulf %28, %29 : vector<16x16xf32>
    %cst_24 = arith.constant dense<0.000000e+00> : vector<16x1xf32>
    %31 = tpu.matmul %30, %8, %cst_24 {dimension_numbers = #tpu.dot_dimension_numbers<[1], [0], [0], [1], [0, 0, 1, 1], [], []>} : vector<16x16xf32>, vector<16x1xf32>, vector<16x1xf32> -> vector<16x1xf32>
    %cst_25 = arith.constant 0.000000e+00 : f32
    %32 = vector.broadcast %cst_25 : f32 to vector<16x1xf32>
    %33 = arith.cmpf ogt, %5, %32 : vector<16x1xf32>
    %cst_26 = arith.constant -1.000000e+30 : f32
    %34 = vector.broadcast %cst_26 : f32 to vector<16x1xf32>
    %35 = arith.select %33, %31, %34 : vector<16x1xi1>, vector<16x1xf32>
    %cst_27 = arith.constant 1.000000e+00 : f32
    %36 = vector.broadcast %cst_27 : f32 to vector<16x1xf32>
    %cst_28 = arith.constant dense<0.000000e+00> : vector<16x16xf32>
    %37 = tpu.matmul %36, %35, %cst_28 {dimension_numbers = #tpu.dot_dimension_numbers<[1], [1], [0], [0], [0, 0, 1, 0], [], []>} : vector<16x1xf32>, vector<16x1xf32>, vector<16x16xf32> -> vector<16x16xf32>
    %38 = tpu.iota {dimensions = array<i32: 0>} : vector<16x16xi32>
    %39 = tpu.iota {dimensions = array<i32: 1>} : vector<16x16xi32>
    %40 = vector.broadcast %35 : vector<16x1xf32> to vector<16x16xf32>
    %41 = arith.cmpf ogt, %40, %37 : vector<16x16xf32>
    %42 = vector.broadcast %35 : vector<16x1xf32> to vector<16x16xf32>
    %43 = arith.cmpf oeq, %42, %37 : vector<16x16xf32>
    %44 = arith.cmpi slt, %38, %39 : vector<16x16xi32>
    %45 = arith.andi %43, %44 : vector<16x16xi1>
    %46 = arith.ori %41, %45 : vector<16x16xi1>
    %47 = arith.extui %46 : vector<16x16xi1> to vector<16x16xi32>
    %48 = arith.sitofp %47 : vector<16x16xi32> to vector<16x16xf32>
    %cst_29 = arith.constant dense<0.000000e+00> : vector<16xf32>
    %49 = vector.multi_reduction <add>, %48, %cst_29 [1] : vector<16x16xf32> to vector<16xf32>
    %50 = vector.shape_cast %49 : vector<16xf32> to vector<16x1xf32>
    %cst_30 = arith.constant 1.500000e+01 : f32
    %51 = vector.broadcast %cst_30 : f32 to vector<16x1xf32>
    %52 = arith.subf %51, %50 : vector<16x1xf32>
    %cst_31 = arith.constant 4.000000e+00 : f32
    %53 = vector.broadcast %cst_31 : f32 to vector<16x1xf32>
    %54 = arith.cmpf olt, %52, %53 : vector<16x1xf32>
    %cst_32 = arith.constant 0.000000e+00 : f32
    %55 = vector.broadcast %cst_32 : f32 to vector<16x1xf32>
    %56 = arith.select %54, %5, %55 : vector<16x1xi1>, vector<16x1xf32>
    %57 = math.tanh %35 : vector<16x1xf32>
    %58 = vector.broadcast %57 : vector<16x1xf32> to vector<16x16xf32>
    %59 = arith.mulf %30, %58 : vector<16x16xf32>
    %60 = vector.broadcast %56 : vector<16x1xf32> to vector<16x16xf32>
    %61 = arith.mulf %59, %60 : vector<16x16xf32>
    %cst_33 = arith.constant dense<0.000000e+00> : vector<16x8xf32>
    %62 = tpu.matmul %61, %9, %cst_33 {dimension_numbers = #tpu.dot_dimension_numbers<[1], [0], [0], [1], [0, 0, 1, 1], [], []>} : vector<16x16xf32>, vector<16x8xf32>, vector<16x8xf32> -> vector<16x8xf32>
    %63 = vector.broadcast %56 : vector<16x1xf32> to vector<16x8xf32>
    %64 = arith.mulf %62, %63 : vector<16x8xf32>
    %cst_34 = arith.constant dense<0.000000e+00> : vector<16x16xf32>
    %65 = tpu.matmul %56, %56, %cst_34 {dimension_numbers = #tpu.dot_dimension_numbers<[1], [1], [0], [0], [0, 0, 1, 0], [], []>} : vector<16x1xf32>, vector<16x1xf32>, vector<16x16xf32> -> vector<16x16xf32>
    %66 = arith.mulf %1, %65 : vector<16x16xf32>
    %c0_35 = arith.constant 0 : index
    %c0_36 = arith.constant 0 : index
    %c0_37 = arith.constant 0 : index
    %67 = vector.load %arg8[%c0_35, %c0_36, %c0_37] : memref<1x16x16xf32, #tpu.memory_space<vmem>>, vector<1x16x16xf32>
    %68 = vector.shape_cast %67 : vector<1x16x16xf32> to vector<16x16xf32>
    %69 = vector.shape_cast %66 : vector<16x16xf32> to vector<1x16x16xf32>
    tpu.vector_store %arg8[%c0_35, %c0_36, %c0_37], %69 {strides = array<i32>} : memref<1x16x16xf32, #tpu.memory_space<vmem>>, vector<1x16x16xf32>,
    %c0_38 = arith.constant 0 : index
    %c0_39 = arith.constant 0 : index
    %c0_40 = arith.constant 0 : index
    %70 = vector.load %arg9[%c0_38, %c0_39, %c0_40] : memref<1x16x8xf32, #tpu.memory_space<vmem>>, vector<1x16x8xf32>
    %71 = vector.shape_cast %70 : vector<1x16x8xf32> to vector<16x8xf32>
    %72 = vector.shape_cast %64 : vector<16x8xf32> to vector<1x16x8xf32>
    tpu.vector_store %arg9[%c0_38, %c0_39, %c0_40], %72 {strides = array<i32>} : memref<1x16x8xf32, #tpu.memory_space<vmem>>, vector<1x16x8xf32>,
    %c0_41 = arith.constant 0 : index
    %c0_42 = arith.constant 0 : index
    %c0_43 = arith.constant 0 : index
    %73 = vector.load %arg10[%c0_41, %c0_42, %c0_43] : memref<1x16x1xf32, #tpu.memory_space<vmem>>, vector<1x16x1xf32>
    %74 = vector.shape_cast %73 : vector<1x16x1xf32> to vector<16x1xf32>
    %75 = vector.shape_cast %56 : vector<16x1xf32> to vector<1x16x1xf32>
    tpu.vector_store %arg10[%c0_41, %c0_42, %c0_43], %75 {strides = array<i32>} : memref<1x16x1xf32, #tpu.memory_space<vmem>>, vector<1x16x1xf32>,
    %cst_44 = arith.constant dense<0.000000e+00> : vector<1xf32>
    %76 = vector.multi_reduction <add>, %56, %cst_44 [0] : vector<16x1xf32> to vector<1xf32>
    %77 = vector.shape_cast %76 : vector<1xf32> to vector<1x1xf32>
    %cst_45 = arith.constant dense<0.000000e+00> : vector<8xf32>
    %78 = vector.multi_reduction <add>, %64, %cst_45 [0] : vector<16x8xf32> to vector<8xf32>
    %79 = vector.shape_cast %78 : vector<8xf32> to vector<1x8xf32>
    %cst_46 = arith.constant 1.000000e+00 : f32
    %80 = vector.broadcast %cst_46 : f32 to vector<1x1xf32>
    %81 = arith.maximumf %77, %80 : vector<1x1xf32>
    %82 = vector.broadcast %81 : vector<1x1xf32> to vector<1x8xf32>
    %83 = arith.divf %79, %82 : vector<1x8xf32>
    %cst_47 = arith.constant 0.000000e+00 : f32
    %84 = vector.broadcast %cst_47 : f32 to vector<16x1xf32>
    %85 = arith.cmpf ogt, %56, %84 : vector<16x1xf32>
    %cst_48 = arith.constant -1.000000e+30 : f32
    %86 = vector.shape_cast %85 : vector<16x1xi1> to vector<16x1xi1>
    %87 = vector.broadcast %86 : vector<16x1xi1> to vector<16x8xi1>
    %88 = vector.broadcast %cst_48 : f32 to vector<16x8xf32>
    %89 = arith.select %87, %64, %88 : vector<16x8xi1>, vector<16x8xf32>
    %cst_49 = arith.constant dense<0xFF800000> : vector<8xf32>
    %90 = vector.multi_reduction <maximumf>, %89, %cst_49 [0] : vector<16x8xf32> to vector<8xf32>
    %91 = vector.shape_cast %90 : vector<8xf32> to vector<1x8xf32>
    %cst_50 = arith.constant 0.000000e+00 : f32
    %92 = vector.broadcast %cst_50 : f32 to vector<1x1xf32>
    %93 = arith.cmpf ogt, %77, %92 : vector<1x1xf32>
    %cst_51 = arith.constant 0.000000e+00 : f32
    %94 = vector.shape_cast %93 : vector<1x1xi1> to vector<1x1xi1>
    %95 = vector.broadcast %94 : vector<1x1xi1> to vector<1x8xi1>
    %96 = vector.broadcast %cst_51 : f32 to vector<1x8xf32>
    %97 = arith.select %95, %91, %96 : vector<1x8xi1>, vector<1x8xf32>
    %c0_52 = arith.constant 0 : index
    %c0_53 = arith.constant 0 : index
    %c0_54 = arith.constant 0 : index
    %98 = vector.load %arg11[%c0_52, %c0_53, %c0_54] : memref<1x1x16xf32, #tpu.memory_space<vmem>>, vector<1x1x8xf32>
    %99 = vector.shape_cast %98 : vector<1x1x8xf32> to vector<1x8xf32>
    %100 = vector.shape_cast %83 : vector<1x8xf32> to vector<1x1x8xf32>
    tpu.vector_store %arg11[%c0_52, %c0_53, %c0_54], %100 {strides = array<i32>} : memref<1x1x16xf32, #tpu.memory_space<vmem>>, vector<1x1x8xf32>,
    %c0_55 = arith.constant 0 : index
    %c0_56 = arith.constant 0 : index
    %c8 = arith.constant 8 : index
    %101 = vector.load %arg11[%c0_55, %c0_56, %c8] : memref<1x1x16xf32, #tpu.memory_space<vmem>>, vector<1x1x8xf32>
    %102 = vector.shape_cast %101 : vector<1x1x8xf32> to vector<1x8xf32>
    %103 = vector.shape_cast %97 : vector<1x8xf32> to vector<1x1x8xf32>
    tpu.vector_store %arg11[%c0_55, %c0_56, %c8], %103 {strides = array<i32>} : memref<1x1x16xf32, #tpu.memory_space<vmem>>, vector<1x1x8xf32>,
    return
  }
  func.func @transform_0(%arg0: i32) -> (i32, i32, i32) {
    %c0_i32 = arith.constant 0 : i32
    %c0_i32_0 = arith.constant 0 : i32
    %c0_i32_1 = arith.constant 0 : i32
    return %arg0, %c0_i32, %c0_i32_0 : i32, i32, i32
  }
  func.func @transform_1(%arg0: i32) -> (i32, i32, i32) {
    %c0_i32 = arith.constant 0 : i32
    %c0_i32_0 = arith.constant 0 : i32
    %c0_i32_1 = arith.constant 0 : i32
    return %arg0, %c0_i32, %c0_i32_0 : i32, i32, i32
  }
  func.func @transform_2(%arg0: i32) -> (i32, i32, i32) {
    %c0_i32 = arith.constant 0 : i32
    %c0_i32_0 = arith.constant 0 : i32
    %c0_i32_1 = arith.constant 0 : i32
    return %arg0, %c0_i32, %c0_i32_0 : i32, i32, i32
  }
  func.func @transform_3(%arg0: i32) -> (i32, i32) {
    %c0_i32 = arith.constant 0 : i32
    %c0_i32_0 = arith.constant 0 : i32
    %c0_i32_1 = arith.constant 0 : i32
    return %c0_i32, %c0_i32_0 : i32, i32
  }
  func.func @transform_4(%arg0: i32) -> (i32, i32) {
    %c0_i32 = arith.constant 0 : i32
    %c0_i32_0 = arith.constant 0 : i32
    %c0_i32_1 = arith.constant 0 : i32
    return %c0_i32, %c0_i32_0 : i32, i32
  }
  func.func @transform_5(%arg0: i32) -> (i32, i32) {
    %c0_i32 = arith.constant 0 : i32
    %c0_i32_0 = arith.constant 0 : i32
    %c0_i32_1 = arith.constant 0 : i32
    return %c0_i32, %c0_i32_0 : i32, i32
  }
  func.func @transform_6(%arg0: i32) -> (i32, i32) {
    %c0_i32 = arith.constant 0 : i32
    %c0_i32_0 = arith.constant 0 : i32
    %c0_i32_1 = arith.constant 0 : i32
    return %c0_i32, %c0_i32_0 : i32, i32
  }
  func.func @transform_7(%arg0: i32) -> (i32, i32, i32) {
    %c0_i32 = arith.constant 0 : i32
    %c0_i32_0 = arith.constant 0 : i32
    %c0_i32_1 = arith.constant 0 : i32
    return %arg0, %c0_i32, %c0_i32_0 : i32, i32, i32
  }
  func.func @transform_8(%arg0: i32) -> (i32, i32, i32) {
    %c0_i32 = arith.constant 0 : i32
    %c0_i32_0 = arith.constant 0 : i32
    %c0_i32_1 = arith.constant 0 : i32
    return %arg0, %c0_i32, %c0_i32_0 : i32, i32, i32
  }
  func.func @transform_9(%arg0: i32) -> (i32, i32, i32) {
    %c0_i32 = arith.constant 0 : i32
    %c0_i32_0 = arith.constant 0 : i32
    %c0_i32_1 = arith.constant 0 : i32
    return %arg0, %c0_i32, %c0_i32_0 : i32, i32, i32
  }
  func.func @transform_10(%arg0: i32) -> (i32, i32, i32) {
    %c0_i32 = arith.constant 0 : i32
    %c0_i32_0 = arith.constant 0 : i32
    %c0_i32_1 = arith.constant 0 : i32
    return %arg0, %c0_i32, %c0_i32_0 : i32, i32, i32
  }
}

module attributes {stable_mosaic.version = 11 : i64} {
  func.func @_stage_kernel(%arg0: i32, %arg1: memref<1x16x16xf32, #tpu.memory_space<vmem>>, %arg2: memref<1x16x8xf32, #tpu.memory_space<vmem>>, %arg3: memref<1x16x1xf32, #tpu.memory_space<vmem>>, %arg4: memref<8x8xf32, #tpu.memory_space<vmem>>, %arg5: memref<1x8xf32, #tpu.memory_space<vmem>>, %arg6: memref<8x1xf32, #tpu.memory_space<vmem>>, %arg7: memref<8x4xf32, #tpu.memory_space<vmem>>, %arg8: memref<1x16x16xf32, #tpu.memory_space<vmem>>, %arg9: memref<1x16x4xf32, #tpu.memory_space<vmem>>, %arg10: memref<1x16x1xf32, #tpu.memory_space<vmem>>, %arg11: memref<1x1x8xf32, #tpu.memory_space<vmem>>) attributes {dimension_semantics = [#tpu.dimension_semantics<parallel>], iteration_bounds = array<i64: 2>, scalar_prefetch = 0 : i64, scratch_operands = 0 : i64, tpu.core_type = #tpu.core_type<tc>, window_params = [{transform_indices = @transform_0, window_bounds = array<i64: 1, 16, 16>}, {transform_indices = @transform_1, window_bounds = array<i64: 1, 16, 8>}, {transform_indices = @transform_2, window_bounds = array<i64: 1, 16, 1>}, {pipeline_mode = #tpu.pipeline_mode<synchronous>, transform_indices = @transform_3, window_bounds = array<i64: 8, 8>}, {pipeline_mode = #tpu.pipeline_mode<synchronous>, transform_indices = @transform_4, window_bounds = array<i64: 1, 8>}, {pipeline_mode = #tpu.pipeline_mode<synchronous>, transform_indices = @transform_5, window_bounds = array<i64: 8, 1>}, {pipeline_mode = #tpu.pipeline_mode<synchronous>, transform_indices = @transform_6, window_bounds = array<i64: 8, 4>}, {transform_indices = @transform_7, window_bounds = array<i64: 1, 16, 16>}, {transform_indices = @transform_8, window_bounds = array<i64: 1, 16, 4>}, {transform_indices = @transform_9, window_bounds = array<i64: 1, 16, 1>}, {transform_indices = @transform_10, window_bounds = array<i64: 1, 1, 8>}]} {
    %c0 = arith.constant 0 : index
    %c0_0 = arith.constant 0 : index
    %c0_1 = arith.constant 0 : index
    %0 = vector.load %arg1[%c0, %c0_0, %c0_1] : memref<1x16x16xf32, #tpu.memory_space<vmem>>, vector<1x16x16xf32>
    %1 = vector.shape_cast %0 : vector<1x16x16xf32> to vector<16x16xf32>
    %c0_2 = arith.constant 0 : index
    %c0_3 = arith.constant 0 : index
    %c0_4 = arith.constant 0 : index
    %2 = vector.load %arg2[%c0_2, %c0_3, %c0_4] : memref<1x16x8xf32, #tpu.memory_space<vmem>>, vector<1x16x8xf32>
    %3 = vector.shape_cast %2 : vector<1x16x8xf32> to vector<16x8xf32>
    %c0_5 = arith.constant 0 : index
    %c0_6 = arith.constant 0 : index
    %c0_7 = arith.constant 0 : index
    %4 = vector.load %arg3[%c0_5, %c0_6, %c0_7] : memref<1x16x1xf32, #tpu.memory_space<vmem>>, vector<1x16x1xf32>
    %5 = vector.shape_cast %4 : vector<1x16x1xf32> to vector<16x1xf32>
    %c0_8 = arith.constant 0 : index
    %c0_9 = arith.constant 0 : index
    %6 = vector.load %arg4[%c0_8, %c0_9] : memref<8x8xf32, #tpu.memory_space<vmem>>, vector<8x8xf32>
    %c0_10 = arith.constant 0 : index
    %c0_11 = arith.constant 0 : index
    %7 = vector.load %arg5[%c0_10, %c0_11] : memref<1x8xf32, #tpu.memory_space<vmem>>, vector<1x8xf32>
    %c0_12 = arith.constant 0 : index
    %c0_13 = arith.constant 0 : index
    %8 = vector.load %arg6[%c0_12, %c0_13] : memref<8x1xf32, #tpu.memory_space<vmem>>, vector<8x1xf32>
    %c0_14 = arith.constant 0 : index
    %c0_15 = arith.constant 0 : index
    %9 = vector.load %arg7[%c0_14, %c0_15] : memref<8x4xf32, #tpu.memory_space<vmem>>, vector<8x4xf32>
    %cst = arith.constant dense<0.000000e+00> : vector<16x16xf32>
    %10 = tpu.matmul %5, %5, %cst {dimension_numbers = #tpu.dot_dimension_numbers<[1], [1], [0], [0], [0, 0, 1, 0], [], []>} : vector<16x1xf32>, vector<16x1xf32>, vector<16x16xf32> -> vector<16x16xf32>
    %11 = arith.mulf %1, %10 : vector<16x16xf32>
    %cst_16 = arith.constant dense<0.000000e+00> : vector<16xf32>
    %12 = vector.multi_reduction <add>, %11, %cst_16 [1] : vector<16x16xf32> to vector<16xf32>
    %13 = vector.shape_cast %12 : vector<16xf32> to vector<16x1xf32>
    %cst_17 = arith.constant 0.000000e+00 : f32
    %14 = vector.broadcast %cst_17 : f32 to vector<16x1xf32>
    %15 = arith.cmpf ogt, %13, %14 : vector<16x1xf32>
    %cst_18 = arith.constant 9.99999996E-13 : f32
    %16 = vector.broadcast %cst_18 : f32 to vector<16x1xf32>
    %17 = arith.maximumf %13, %16 : vector<16x1xf32>
    %18 = math.rsqrt %17 : vector<16x1xf32>
    %cst_19 = arith.constant 0.000000e+00 : f32
    %19 = vector.broadcast %cst_19 : f32 to vector<16x1xf32>
    %20 = arith.select %15, %18, %19 : vector<16x1xi1>, vector<16x1xf32>
    %cst_20 = arith.constant dense<0.000000e+00> : vector<16x16xf32>
    %21 = tpu.matmul %20, %20, %cst_20 {dimension_numbers = #tpu.dot_dimension_numbers<[1], [1], [0], [0], [0, 0, 1, 0], [], []>} : vector<16x1xf32>, vector<16x1xf32>, vector<16x16xf32> -> vector<16x16xf32>
    %22 = arith.mulf %11, %21 : vector<16x16xf32>
    %cst_21 = arith.constant dense<0.000000e+00> : vector<16x8xf32>
    %23 = tpu.matmul %3, %6, %cst_21 {dimension_numbers = #tpu.dot_dimension_numbers<[1], [0], [0], [1], [0, 0, 1, 1], [], []>} : vector<16x8xf32>, vector<8x8xf32>, vector<16x8xf32> -> vector<16x8xf32>
    %cst_22 = arith.constant dense<0.000000e+00> : vector<16x8xf32>
    %24 = tpu.matmul %22, %23, %cst_22 {dimension_numbers = #tpu.dot_dimension_numbers<[1], [0], [0], [1], [0, 0, 1, 1], [], []>} : vector<16x16xf32>, vector<16x8xf32>, vector<16x8xf32> -> vector<16x8xf32>
    %25 = vector.broadcast %7 : vector<1x8xf32> to vector<16x8xf32>
    %26 = arith.addf %24, %25 : vector<16x8xf32>
    %cst_23 = arith.constant 0.000000e+00 : f32
    %27 = vector.broadcast %cst_23 : f32 to vector<16x8xf32>
    %28 = arith.maximumf %26, %27 : vector<16x8xf32>
    %29 = vector.broadcast %5 : vector<16x1xf32> to vector<16x8xf32>
    %30 = arith.mulf %28, %29 : vector<16x8xf32>
    %cst_24 = arith.constant dense<0.000000e+00> : vector<16x1xf32>
    %31 = tpu.matmul %30, %8, %cst_24 {dimension_numbers = #tpu.dot_dimension_numbers<[1], [0], [0], [1], [0, 0, 1, 1], [], []>} : vector<16x8xf32>, vector<8x1xf32>, vector<16x1xf32> -> vector<16x1xf32>
    %cst_25 = arith.constant 0.000000e+00 : f32
    %32 = vector.broadcast %cst_25 : f32 to vector<16x1xf32>
    %33 = arith.cmpf ogt, %5, %32 : vector<16x1xf32>
    %cst_26 = arith.constant -1.000000e+30 : f32
    %34 = vector.broadcast %cst_26 : f32 to vector<16x1xf32>
    %35 = arith.select %33, %31, %34 : vector<16x1xi1>, vector<16x1xf32>
    %cst_27 = arith.constant 1.000000e+00 : f32
    %36 = vector.broadcast %cst_27 : f32 to vector<16x1xf32>
    %cst_28 = arith.constant dense<0.000000e+00> : vector<16x16xf32>
    %37 = tpu.matmul %36, %35, %cst_28 {dimension_numbers = #tpu.dot_dimension_numbers<[1], [1], [0], [0], [0, 0, 1, 0], [], []>} : vector<16x1xf32>, vector<16x1xf32>, vector<16x16xf32> -> vector<16x16xf32>
    %38 = tpu.iota {dimensions = array<i32: 0>} : vector<16x16xi32>
    %39 = tpu.iota {dimensions = array<i32: 1>} : vector<16x16xi32>
    %40 = vector.broadcast %35 : vector<16x1xf32> to vector<16x16xf32>
    %41 = arith.cmpf ogt, %40, %37 : vector<16x16xf32>
    %42 = vector.broadcast %35 : vector<16x1xf32> to vector<16x16xf32>
    %43 = arith.cmpf oeq, %42, %37 : vector<16x16xf32>
    %44 = arith.cmpi slt, %38, %39 : vector<16x16xi32>
    %45 = arith.andi %43, %44 : vector<16x16xi1>
    %46 = arith.ori %41, %45 : vector<16x16xi1>
    %47 = arith.extui %46 : vector<16x16xi1> to vector<16x16xi32>
    %48 = arith.sitofp %47 : vector<16x16xi32> to vector<16x16xf32>
    %cst_29 = arith.constant dense<0.000000e+00> : vector<16xf32>
    %49 = vector.multi_reduction <add>, %48, %cst_29 [1] : vector<16x16xf32> to vector<16xf32>
    %50 = vector.shape_cast %49 : vector<16xf32> to vector<16x1xf32>
    %cst_30 = arith.constant 1.500000e+01 : f32
    %51 = vector.broadcast %cst_30 : f32 to vector<16x1xf32>
    %52 = arith.subf %51, %50 : vector<16x1xf32>
    %cst_31 = arith.constant 2.000000e+00 : f32
    %53 = vector.broadcast %cst_31 : f32 to vector<16x1xf32>
    %54 = arith.cmpf olt, %52, %53 : vector<16x1xf32>
    %cst_32 = arith.constant 0.000000e+00 : f32
    %55 = vector.broadcast %cst_32 : f32 to vector<16x1xf32>
    %56 = arith.select %54, %5, %55 : vector<16x1xi1>, vector<16x1xf32>
    %57 = math.tanh %35 : vector<16x1xf32>
    %58 = vector.broadcast %57 : vector<16x1xf32> to vector<16x8xf32>
    %59 = arith.mulf %30, %58 : vector<16x8xf32>
    %60 = vector.broadcast %56 : vector<16x1xf32> to vector<16x8xf32>
    %61 = arith.mulf %59, %60 : vector<16x8xf32>
    %cst_33 = arith.constant dense<0.000000e+00> : vector<16x4xf32>
    %62 = tpu.matmul %61, %9, %cst_33 {dimension_numbers = #tpu.dot_dimension_numbers<[1], [0], [0], [1], [0, 0, 1, 1], [], []>} : vector<16x8xf32>, vector<8x4xf32>, vector<16x4xf32> -> vector<16x4xf32>
    %63 = vector.broadcast %56 : vector<16x1xf32> to vector<16x4xf32>
    %64 = arith.mulf %62, %63 : vector<16x4xf32>
    %cst_34 = arith.constant dense<0.000000e+00> : vector<16x16xf32>
    %65 = tpu.matmul %56, %56, %cst_34 {dimension_numbers = #tpu.dot_dimension_numbers<[1], [1], [0], [0], [0, 0, 1, 0], [], []>} : vector<16x1xf32>, vector<16x1xf32>, vector<16x16xf32> -> vector<16x16xf32>
    %66 = arith.mulf %1, %65 : vector<16x16xf32>
    %c0_35 = arith.constant 0 : index
    %c0_36 = arith.constant 0 : index
    %c0_37 = arith.constant 0 : index
    %67 = vector.load %arg8[%c0_35, %c0_36, %c0_37] : memref<1x16x16xf32, #tpu.memory_space<vmem>>, vector<1x16x16xf32>
    %68 = vector.shape_cast %67 : vector<1x16x16xf32> to vector<16x16xf32>
    %69 = vector.shape_cast %66 : vector<16x16xf32> to vector<1x16x16xf32>
    tpu.vector_store %arg8[%c0_35, %c0_36, %c0_37], %69 {strides = array<i32>} : memref<1x16x16xf32, #tpu.memory_space<vmem>>, vector<1x16x16xf32>,
    %c0_38 = arith.constant 0 : index
    %c0_39 = arith.constant 0 : index
    %c0_40 = arith.constant 0 : index
    %70 = vector.load %arg9[%c0_38, %c0_39, %c0_40] : memref<1x16x4xf32, #tpu.memory_space<vmem>>, vector<1x16x4xf32>
    %71 = vector.shape_cast %70 : vector<1x16x4xf32> to vector<16x4xf32>
    %72 = vector.shape_cast %64 : vector<16x4xf32> to vector<1x16x4xf32>
    tpu.vector_store %arg9[%c0_38, %c0_39, %c0_40], %72 {strides = array<i32>} : memref<1x16x4xf32, #tpu.memory_space<vmem>>, vector<1x16x4xf32>,
    %c0_41 = arith.constant 0 : index
    %c0_42 = arith.constant 0 : index
    %c0_43 = arith.constant 0 : index
    %73 = vector.load %arg10[%c0_41, %c0_42, %c0_43] : memref<1x16x1xf32, #tpu.memory_space<vmem>>, vector<1x16x1xf32>
    %74 = vector.shape_cast %73 : vector<1x16x1xf32> to vector<16x1xf32>
    %75 = vector.shape_cast %56 : vector<16x1xf32> to vector<1x16x1xf32>
    tpu.vector_store %arg10[%c0_41, %c0_42, %c0_43], %75 {strides = array<i32>} : memref<1x16x1xf32, #tpu.memory_space<vmem>>, vector<1x16x1xf32>,
    %cst_44 = arith.constant dense<0.000000e+00> : vector<1xf32>
    %76 = vector.multi_reduction <add>, %56, %cst_44 [0] : vector<16x1xf32> to vector<1xf32>
    %77 = vector.shape_cast %76 : vector<1xf32> to vector<1x1xf32>
    %cst_45 = arith.constant dense<0.000000e+00> : vector<4xf32>
    %78 = vector.multi_reduction <add>, %64, %cst_45 [0] : vector<16x4xf32> to vector<4xf32>
    %79 = vector.shape_cast %78 : vector<4xf32> to vector<1x4xf32>
    %cst_46 = arith.constant 1.000000e+00 : f32
    %80 = vector.broadcast %cst_46 : f32 to vector<1x1xf32>
    %81 = arith.maximumf %77, %80 : vector<1x1xf32>
    %82 = vector.broadcast %81 : vector<1x1xf32> to vector<1x4xf32>
    %83 = arith.divf %79, %82 : vector<1x4xf32>
    %cst_47 = arith.constant 0.000000e+00 : f32
    %84 = vector.broadcast %cst_47 : f32 to vector<16x1xf32>
    %85 = arith.cmpf ogt, %56, %84 : vector<16x1xf32>
    %cst_48 = arith.constant -1.000000e+30 : f32
    %86 = vector.shape_cast %85 : vector<16x1xi1> to vector<16x1xi1>
    %87 = vector.broadcast %86 : vector<16x1xi1> to vector<16x4xi1>
    %88 = vector.broadcast %cst_48 : f32 to vector<16x4xf32>
    %89 = arith.select %87, %64, %88 : vector<16x4xi1>, vector<16x4xf32>
    %cst_49 = arith.constant dense<0xFF800000> : vector<4xf32>
    %90 = vector.multi_reduction <maximumf>, %89, %cst_49 [0] : vector<16x4xf32> to vector<4xf32>
    %91 = vector.shape_cast %90 : vector<4xf32> to vector<1x4xf32>
    %cst_50 = arith.constant 0.000000e+00 : f32
    %92 = vector.broadcast %cst_50 : f32 to vector<1x1xf32>
    %93 = arith.cmpf ogt, %77, %92 : vector<1x1xf32>
    %cst_51 = arith.constant 0.000000e+00 : f32
    %94 = vector.shape_cast %93 : vector<1x1xi1> to vector<1x1xi1>
    %95 = vector.broadcast %94 : vector<1x1xi1> to vector<1x4xi1>
    %96 = vector.broadcast %cst_51 : f32 to vector<1x4xf32>
    %97 = arith.select %95, %91, %96 : vector<1x4xi1>, vector<1x4xf32>
    %c0_52 = arith.constant 0 : index
    %c0_53 = arith.constant 0 : index
    %c0_54 = arith.constant 0 : index
    %98 = vector.load %arg11[%c0_52, %c0_53, %c0_54] : memref<1x1x8xf32, #tpu.memory_space<vmem>>, vector<1x1x4xf32>
    %99 = vector.shape_cast %98 : vector<1x1x4xf32> to vector<1x4xf32>
    %100 = vector.shape_cast %83 : vector<1x4xf32> to vector<1x1x4xf32>
    tpu.vector_store %arg11[%c0_52, %c0_53, %c0_54], %100 {strides = array<i32>} : memref<1x1x8xf32, #tpu.memory_space<vmem>>, vector<1x1x4xf32>,
    %c0_55 = arith.constant 0 : index
    %c0_56 = arith.constant 0 : index
    %c4 = arith.constant 4 : index
    %101 = vector.load %arg11[%c0_55, %c0_56, %c4] : memref<1x1x8xf32, #tpu.memory_space<vmem>>, vector<1x1x4xf32>
    %102 = vector.shape_cast %101 : vector<1x1x4xf32> to vector<1x4xf32>
    %103 = vector.shape_cast %97 : vector<1x4xf32> to vector<1x1x4xf32>
    tpu.vector_store %arg11[%c0_55, %c0_56, %c4], %103 {strides = array<i32>} : memref<1x1x8xf32, #tpu.memory_space<vmem>>, vector<1x1x4xf32>,
    return
  }
  func.func @transform_0(%arg0: i32) -> (i32, i32, i32) {
    %c0_i32 = arith.constant 0 : i32
    %c0_i32_0 = arith.constant 0 : i32
    %c0_i32_1 = arith.constant 0 : i32
    return %arg0, %c0_i32, %c0_i32_0 : i32, i32, i32
  }
  func.func @transform_1(%arg0: i32) -> (i32, i32, i32) {
    %c0_i32 = arith.constant 0 : i32
    %c0_i32_0 = arith.constant 0 : i32
    %c0_i32_1 = arith.constant 0 : i32
    return %arg0, %c0_i32, %c0_i32_0 : i32, i32, i32
  }
  func.func @transform_2(%arg0: i32) -> (i32, i32, i32) {
    %c0_i32 = arith.constant 0 : i32
    %c0_i32_0 = arith.constant 0 : i32
    %c0_i32_1 = arith.constant 0 : i32
    return %arg0, %c0_i32, %c0_i32_0 : i32, i32, i32
  }
  func.func @transform_3(%arg0: i32) -> (i32, i32) {
    %c0_i32 = arith.constant 0 : i32
    %c0_i32_0 = arith.constant 0 : i32
    %c0_i32_1 = arith.constant 0 : i32
    return %c0_i32, %c0_i32_0 : i32, i32
  }
  func.func @transform_4(%arg0: i32) -> (i32, i32) {
    %c0_i32 = arith.constant 0 : i32
    %c0_i32_0 = arith.constant 0 : i32
    %c0_i32_1 = arith.constant 0 : i32
    return %c0_i32, %c0_i32_0 : i32, i32
  }
  func.func @transform_5(%arg0: i32) -> (i32, i32) {
    %c0_i32 = arith.constant 0 : i32
    %c0_i32_0 = arith.constant 0 : i32
    %c0_i32_1 = arith.constant 0 : i32
    return %c0_i32, %c0_i32_0 : i32, i32
  }
  func.func @transform_6(%arg0: i32) -> (i32, i32) {
    %c0_i32 = arith.constant 0 : i32
    %c0_i32_0 = arith.constant 0 : i32
    %c0_i32_1 = arith.constant 0 : i32
    return %c0_i32, %c0_i32_0 : i32, i32
  }
  func.func @transform_7(%arg0: i32) -> (i32, i32, i32) {
    %c0_i32 = arith.constant 0 : i32
    %c0_i32_0 = arith.constant 0 : i32
    %c0_i32_1 = arith.constant 0 : i32
    return %arg0, %c0_i32, %c0_i32_0 : i32, i32, i32
  }
  func.func @transform_8(%arg0: i32) -> (i32, i32, i32) {
    %c0_i32 = arith.constant 0 : i32
    %c0_i32_0 = arith.constant 0 : i32
    %c0_i32_1 = arith.constant 0 : i32
    return %arg0, %c0_i32, %c0_i32_0 : i32, i32, i32
  }
  func.func @transform_9(%arg0: i32) -> (i32, i32, i32) {
    %c0_i32 = arith.constant 0 : i32
    %c0_i32_0 = arith.constant 0 : i32
    %c0_i32_1 = arith.constant 0 : i32
    return %arg0, %c0_i32, %c0_i32_0 : i32, i32, i32
  }
  func.func @transform_10(%arg0: i32) -> (i32, i32, i32) {
    %c0_i32 = arith.constant 0 : i32
    %c0_i32_0 = arith.constant 0 : i32
    %c0_i32_1 = arith.constant 0 : i32
    return %arg0, %c0_i32, %c0_i32_0 : i32, i32, i32
  }
}

module attributes {stable_mosaic.version = 11 : i64} {
  func.func @_head_kernel(%arg0: memref<2x32xf32, #tpu.memory_space<vmem>>, %arg1: memref<2x16xf32, #tpu.memory_space<vmem>>, %arg2: memref<2x8xf32, #tpu.memory_space<vmem>>, %arg3: memref<32x8xf32, #tpu.memory_space<vmem>>, %arg4: memref<1x8xf32, #tpu.memory_space<vmem>>, %arg5: memref<16x8xf32, #tpu.memory_space<vmem>>, %arg6: memref<1x8xf32, #tpu.memory_space<vmem>>, %arg7: memref<2x8xf32, #tpu.memory_space<vmem>>) attributes {dimension_semantics = [], scalar_prefetch = 0 : i64, scratch_operands = 0 : i64, tpu.core_type = #tpu.core_type<tc>} {
    %c0 = arith.constant 0 : index
    %c0_0 = arith.constant 0 : index
    %0 = vector.load %arg0[%c0, %c0_0] : memref<2x32xf32, #tpu.memory_space<vmem>>, vector<2x32xf32>
    %c0_1 = arith.constant 0 : index
    %c0_2 = arith.constant 0 : index
    %1 = vector.load %arg3[%c0_1, %c0_2] : memref<32x8xf32, #tpu.memory_space<vmem>>, vector<32x8xf32>
    %cst = arith.constant dense<0.000000e+00> : vector<2x8xf32>
    %2 = tpu.matmul %0, %1, %cst {dimension_numbers = #tpu.dot_dimension_numbers<[1], [0], [0], [1], [0, 0, 1, 1], [], []>} : vector<2x32xf32>, vector<32x8xf32>, vector<2x8xf32> -> vector<2x8xf32>
    %c0_3 = arith.constant 0 : index
    %c0_4 = arith.constant 0 : index
    %3 = vector.load %arg4[%c0_3, %c0_4] : memref<1x8xf32, #tpu.memory_space<vmem>>, vector<1x8xf32>
    %4 = vector.broadcast %3 : vector<1x8xf32> to vector<2x8xf32>
    %5 = arith.addf %2, %4 : vector<2x8xf32>
    %c0_5 = arith.constant 0 : index
    %c0_6 = arith.constant 0 : index
    %6 = vector.load %arg1[%c0_5, %c0_6] : memref<2x16xf32, #tpu.memory_space<vmem>>, vector<2x16xf32>
    %c0_7 = arith.constant 0 : index
    %c0_8 = arith.constant 0 : index
    %7 = vector.load %arg5[%c0_7, %c0_8] : memref<16x8xf32, #tpu.memory_space<vmem>>, vector<16x8xf32>
    %cst_9 = arith.constant dense<0.000000e+00> : vector<2x8xf32>
    %8 = tpu.matmul %6, %7, %cst_9 {dimension_numbers = #tpu.dot_dimension_numbers<[1], [0], [0], [1], [0, 0, 1, 1], [], []>} : vector<2x16xf32>, vector<16x8xf32>, vector<2x8xf32> -> vector<2x8xf32>
    %c0_10 = arith.constant 0 : index
    %c0_11 = arith.constant 0 : index
    %9 = vector.load %arg6[%c0_10, %c0_11] : memref<1x8xf32, #tpu.memory_space<vmem>>, vector<1x8xf32>
    %10 = vector.broadcast %9 : vector<1x8xf32> to vector<2x8xf32>
    %11 = arith.addf %8, %10 : vector<2x8xf32>
    %12 = arith.addf %5, %11 : vector<2x8xf32>
    %c0_12 = arith.constant 0 : index
    %c0_13 = arith.constant 0 : index
    %13 = vector.load %arg2[%c0_12, %c0_13] : memref<2x8xf32, #tpu.memory_space<vmem>>, vector<2x8xf32>
    %14 = arith.addf %12, %13 : vector<2x8xf32>
    %c0_14 = arith.constant 0 : index
    %c0_15 = arith.constant 0 : index
    %15 = vector.load %arg7[%c0_14, %c0_15] : memref<2x8xf32, #tpu.memory_space<vmem>>, vector<2x8xf32>
    tpu.vector_store %arg7[%c0_14, %c0_15], %14 {strides = array<i32>} : memref<2x8xf32, #tpu.memory_space<vmem>>, vector<2x8xf32>,
    return
  }
}

</mosaic_0001>

<bundles_post_ra>
// kernel: lugtp_forward.4
= control target key start
LH: loop header
LB: loop body
LE: loop exit
PB: predicated region body
PF: predicated region fallthrough
CT: control target
= control target key end

     0   :  { %s1694_s13 = smov 0   ;;  %s1856_s0 = inlined_call_operand.vmem [shape: f32[2,16,16], index: 0, kind: input, shape index: {}]   ;;  %s1857_s1 = inlined_call_operand.vmem [shape: f32[2,16,16], index: 1, kind: input, shape index: {}]   ;;  %s1858_s2 = inlined_call_operand.vmem [shape: f32[2,16,1], index: 2, kind: input, shape index: {}]   ;;  %s1859_s3 = inlined_call_operand.vmem [shape: f32[16,32], index: 3, kind: input, shape index: {}]   ;;  %s1860_s4 = inlined_call_operand.vmem [shape: f32[1,32], index: 4, kind: input, shape index: {}]   ;;  %s1861_s5 = inlined_call_operand.vmem [shape: f32[32,1], index: 5, kind: input, shape index: {}]   ;;  %s1862_s6 = inlined_call_operand.vmem [shape: f32[32,16], index: 6, kind: input, shape index: {}]   ;;  %s1863_s7 = inlined_call_operand.vmem [shape: f32[2,16,16], index: 7, kind: output, shape index: {0}]   ;;  %s1864_s8 = inlined_call_operand.vmem [shape: f32[2,16,16], index: 8, kind: output, shape index: {1}]   ;;  %s1865_s9 = inlined_call_operand.vmem [shape: f32[2,16,1], index: 9, kind: output, shape index: {2}]   ;;  %s1866_s10 = inlined_call_operand.vmem [shape: f32[2,1,32], index: 10, kind: output, shape index: {3}]  }
   0x1 LB: > { %s1451_s14 = sadd.s32 4294967295, %s1633_s13   ;;  %p1455_p0 = scmp.ge.s32.totalorder %s1633_s13, 1  ;;  %s1633_s13 = sphi %s1694_s13, %s21_s13  }
   0x2   : > { %p339_p1 = scmp.lt.s32.totalorder %s1633_s13, 3 }
   0x4   : > { %p340_p2 = pnand %p1455_p0, %p339_p1 }
   0x5   : > { %p400_p3 = scmp.lt.s32.totalorder (!%p340_p2), %s1451_s14, 1  ;;  %s1638_s24 = smov (!%p340_p2), 16  }
   0x6   : > { %343 = sbr.rel (%p340_p2) target bundleno = 1786 (0x6fa), region = 48 }
   0xb   : > { %s1868_s14 = smov (!%p400_p3, %s1451_s14), 1  ;;  %vm450_vm0 = vcmask 7168   ;;  %vm534_vm1 = vcmask 130048   ;;  %v440_v10 = vld [vmem:[%s1859_s3 + $0x8] sm:$0xff]  ;;  %v439_v11 = vld [vmem:[%s1859_s3] sm:$0xff]  ;;  %v1635_v24 = vmov 0   ;;  %v982_v50 = vlaneseq }
   0xc   : > { %s1705_s15 = sshll.u32 %s1868_s14, 4  ;;  %1615 = vset.pattern.permute.xlu1 %v1635_v24  ;;  %1616 = vset.pattern.permute.xlu0 %v1635_v24  ;;  %v445_v29 = vld [vmem:[%s1861_s5 + $0x18] sm:$0xff]  ;;  %v444_v30 = vld [vmem:[%s1861_s5 + $0x10] sm:$0xff]  ;;  %v443_v31 = vld [vmem:[%s1861_s5 + $0x8] sm:$0xff]  ;;  %vm812_vm4 = vcmask 261120   ;;  %v1636_v44 = vmov 1.0   ;;  %s432_s23 = scalar_lea.vmem %s1866_s10, %s1868_s14 }
   0xd   : > { %s414_s18 = scalar_lea.vmem %s1858_s2, %s1705_s15  ;;  %s404_s21 = scalar_lea.vmem %s1856_s0, %s1705_s15  ;;  %v442_v32 = vld [vmem:[%s1861_s5] sm:$0xff]  ;;  %v983_v51 = vshrl.u32 %v982_v50, 7  ;;  %v986_v53 = vand.u32 127, %v982_v50  ;;  %v1637_v58 = vmov 0.0  }
   0xe   : > { %v1711_v0 = vld [vmem:[%s414_s18 + $0x8] sm:$0xff]  ;;  %v1713_v1 = vld [vmem:[%s414_s18] sm:$0xff]  ;;  %s409_s28 = scalar_lea.vmem %s1857_s1, %s1705_s15  ;;  %s429_s30 = scalar_lea.vmem %s1865_s9, %s1705_s15 }
   0xf   : > { %1539 = vmatprep.subr.msk.mxu0 %vm450_vm0, %v1711_v0  ;;  %1543 = vmatprep.mubr.msk.f32.mxu0 %vm450_vm0, %v1713_v1  ;;  %v1731_v2 = vld [vmem:[%s404_s21 + $0x8] sm:$0xff]  ;;  %v1733_v4 = vld [vmem:[%s404_s21] sm:$0xff]  ;;  %vm895_vm5 = vcmp.gt.f32.partialorder %v1711_v0, 0.0  ;;  %vm894_vm6 = vcmp.gt.f32.partialorder %v1713_v1, 0.0  ;;  %v984_v52 = vadd.s32 8, %v983_v51  ;;  %vm999_vm10 = vcmp.lt.s32.totalorder %v983_v51, %v986_v53  ;;  %s419_s18 = scalar_lea.vmem %s1863_s7, %s1705_s15  ;;  %s424_s21 = scalar_lea.vmem %s1864_s8, %s1705_s15 }
  0x10   : > { %1540 = vmatpush3.xpose.msk.msra.mxu0 %vm450_vm0, %v1711_v0  ;;  %v435_v12 = vld [vmem:[%s409_s28] sm:$0xff]  ;;  %v436_v13 = vld [vmem:[%s409_s28 + $0x8] sm:$0xff]  ;;  %803 = vperm.xlu1 %1615, %v1713_v1  }
  0x11   : > { %1541 = vmatprep.subr.msk.mxu0 %vm450_vm0, %v1713_v1  ;;  %v1478_v33 = vld [vmem:[%s1860_s4] ss:$0 sm:$0xff]  ;;  %vm1000_vm7 = vcmp.lt.s32.totalorder %v984_v52, %v986_v53 }
  0x14   : > { %1542 = vmatpush3.xpose.msk.msra.mxu0 %vm450_vm0, %v1713_v1  ;;  %807 = vperm.xlu1 %1615, %v1711_v0  }
  0x15   : > { %1553 = vmatprep.subr.mxu0 %v440_v10 }
  0x17   : > { %1544 = vmatmul.mubr.msk.f32.vlgmr.msra.gmra.mxu0 %vm450_vm0, %v1711_v0 }
  0x18   : > { %1554 = vmatpush3.msra.mxu0 %v440_v10  ;;  %1557 = vmatprep.mubr.msk.f32.mxu0 %vm534_vm1, %v435_v12 }
  0x19   : > { %1555 = vmatprep.subr.mxu0 %v439_v11 }
  0x1a   : > { %1556 = vmatpush3.msra.mxu0 %v439_v11  ;;  %v446_v11 = vld [vmem:[%s1862_s6] sm:$0xff] }
  0x1b   : > { %1558 = vmatmul.mubr.msk.f32.vlgmr.msra.gmra.mxu0 %vm534_vm1, %v436_v13  ;;  %1567 = vmatprep.subr.mxu0 %v445_v29 }
  0x1c   : > { %1568 = vmatpush3.msra.mxu0 %v445_v29 }
  0x1d   : > { %1569 = vmatprep.subr.mxu0 %v444_v30 }
  0x1e   : > { %1570 = vmatpush3.msra.mxu0 %v444_v30 }
  0x1f   : > { %1571 = vmatprep.subr.mxu0 %v443_v31 }
  0x20   : > { %1572 = vmatpush3.msra.mxu0 %v443_v31 }
  0x21   : > { %1573 = vmatprep.subr.mxu0 %v442_v32 }
  0x22   : > { %1574 = vmatpush3.msra.mxu0 %v442_v32 }
  0x8b   : > { %v804_v34 = vpop.permute.xlu1 %803 }
  0x8f   : > { %v808_v41 = vpop.permute.xlu1 %807 }
  0xd7   : > { %v1545_v3 = vpop.f32.mrf.mxu0 }
  0xd8   : > { %v533_v5 = vmul.f32 %v1545_v3, %v1731_v2  ;;  %v449_v3 = vld [vmem:[%s1862_s6 + $0x18] sm:$0xff] }
  0xd9   : > { %v523_v6 = vpop.f32.mrf.mxu0  ;;  %1585 = vmatprep.subr.mxu0 %v449_v3 }
  0xda   : > { %v532_v7 = vmul.f32 %v523_v6, %v1733_v4  ;;  %v538_v8 = vsel %vm534_vm1, %v533_v5, 0.0  ;;  %v448_v6 = vld [vmem:[%s1862_s6 + $0x10] sm:$0xff] }
  0xdb   : > { %539 = vadd.xlane.f32.xlu0 %v538_v8  ;;  %v1559_v22 = vpop.f32.mrf.mxu0  ;;  %v447_v8 = vld [vmem:[%s1862_s6 + $0x8] sm:$0xff] }
  0xdc   : > { %v535_v9 = vsel %vm534_vm1, %v532_v7, 0.0 }
  0xdd   : > { %v704_v23 = vpop.f32.mrf.mxu0 }
  0xdf   : > { %536 = vadd.xlane.f32.xlu0 %v535_v9 }
 0x164   : > { %v540_v14 = vpop.xlane.xlu0 %539 }
 0x165   : > { %v544_v15 = vmax.f32 %v540_v14, 1e-12  ;;  %vm542_vm2 = vcmp.gt.f32.partialorder %v540_v14, 0.0 }
 0x167   : > { %1617 = vrsqrt.f32 %v544_v15 }
 0x168   : > { %v537_v16 = vpop.xlane.xlu0 %536 }
 0x169   : > { %v543_v17 = vmax.f32 %v537_v16, 1e-12  ;;  %vm541_vm3 = vcmp.gt.f32.partialorder %v537_v16, 0.0 }
 0x16b   : > { %1619 = vrsqrt.f32 %v543_v17 }
 0x174   : > { %v1618_v18 = vpop.eup %1617 }
 0x175   : > { %v548_v19 = vsel %vm542_vm2, %v1618_v18, 0.0 }
 0x176   : > { %1546 = vmatprep.subr.msk.mxu1 %vm450_vm0, %v548_v19 }
 0x177   : > { %1547 = vmatpush3.xpose.msk.msra.mxu1 %vm450_vm0, %v548_v19 }
 0x178   : > { %v1620_v20 = vpop.eup %1619 }
 0x179   : > { %v547_v21 = vsel %vm541_vm3, %v1620_v20, 0.0 }
 0x17a   : > { %1548 = vmatprep.subr.msk.mxu1 %vm450_vm0, %v547_v21  ;;  %1550 = vmatprep.mubr.msk.f32.mxu1 %vm450_vm0, %v547_v21 }
 0x17b   : > { %1549 = vmatpush3.xpose.msk.msra.mxu1 %vm450_vm0, %v547_v21 }
 0x17c   : > { %1560 = vmatprep.subr.mxu1 %v1559_v22 }
 0x17e   : > { %1551 = vmatmul.mubr.msk.f32.vlgmr.msra.gmra.mxu1 %vm450_vm0, %v548_v19 }
 0x17f   : > { %1561 = vmatpush3.msra.mxu1 %v1559_v22 }
 0x180   : > { %1562 = vmatprep.subr.mxu1 %v704_v23 }
 0x181   : > { %1563 = vmatpush3.msra.mxu1 %v704_v23 }
 0x23e   : > { %v1552_v25 = vpop.f32.mrf.mxu1 }
 0x23f   : > { %v631_v28 = vmul.f32 %v1552_v25, %v533_v5 }
 0x240   : > { %v621_v26 = vpop.f32.mrf.mxu1 }
 0x241   : > { %v630_v27 = vmul.f32 %v621_v26, %v532_v7 }
 0x243   : > { %1564 = vmatprep.mubr.msk.f32.mxu1 %vm534_vm1, %v630_v27 }
 0x244   : > { %1565 = vmatmul.mubr.msk.f32.vlgmr.msra.gmra.mxu1 %vm534_vm1, %v631_v28 }
 0x245   : > { %1582 = vmatprep.mubr.msk.f32.mxu1 %vm450_vm0, %v1636_v44 }
 0x304   : > { %v1566_v35 = vpop.f32.mrf.mxu1 }
 0x305   : > { %v797_v36 = vadd.f32 %v1566_v35, %v1478_v33 }
 0x306   : > { %v791_v37 = vpop.f32.mrf.mxu1 }
 0x307   : > { %v792_v38 = vadd.f32 %v1478_v33, %v791_v37  ;;  %v801_v39 = vmax.f32 %v797_v36, 0.0 }
 0x309   : > { %v800_v40 = vmax.f32 %v792_v38, 0.0  ;;  %v1780_v43 = vmul.f32 %v808_v41, %v801_v39 }
 0x30b   : > { %v1778_v42 = vmul.f32 %v804_v34, %v800_v40 }
 0x30d   : > { %1575 = vmatprep.mubr.msk.f32.mxu0 %vm812_vm4, %v1778_v42 }
 0x30e   : > { %1576 = vmatmul.mubr.msk.f32.vlgmr.msra.gmra.mxu0 %vm812_vm4, %v1780_v43 }
 0x30f   : > { %1586 = vmatpush3.msra.mxu0 %v449_v3 }
 0x310   : > { %1587 = vmatprep.subr.mxu0 %v448_v6 }
 0x311   : > { %1588 = vmatpush3.msra.mxu0 %v448_v6 }
 0x312   : > { %1589 = vmatprep.subr.mxu0 %v447_v8 }
 0x313   : > { %1590 = vmatpush3.msra.mxu0 %v447_v8 }
 0x314   : > { %1591 = vmatprep.subr.mxu0 %v446_v11 }
 0x315   : > { %1592 = vmatpush3.msra.mxu0 %v446_v11 }
 0x3ce   : > { %v1577_v45 = vpop.f32.mrf.mxu0 }
 0x3cf   : > { %v897_v46 = vsel %vm895_vm5, %v1577_v45, -1e+30 }
 0x3d0   : > { %992 = vperm.xlu1 %1615, %v897_v46   ;;  %v885_v47 = vpop.f32.mrf.mxu0  ;;  %1578 = vmatprep.subr.msk.mxu1 %vm450_vm0, %v897_v46 }
 0x3d1   : > { %v896_v48 = vsel %vm894_vm6, %v885_v47, -1e+30  ;;  %1579 = vmatpush3.xpose.msk.msra.mxu1 %vm450_vm0, %v897_v46 }
 0x3d2   : > { %1621 = vtanh.f32 %v896_v48  ;;  %988 = vperm.xlu0 %1616, %v896_v48   ;;  %1580 = vmatprep.subr.msk.mxu1 %vm450_vm0, %v896_v48 }
 0x3d3   : > { %1623 = vtanh.f32 %v897_v46 }
 0x3d5   : > { %1581 = vmatpush3.xpose.msk.msra.mxu1 %vm450_vm0, %v896_v48 }
 0x3d8   : > { %1583 = vmatmul.mubr.msk.f32.vlgmr.msra.gmra.mxu1 %vm450_vm0, %v1636_v44 }
 0x3df   : > { %v1622_v49 = vpop.eup %1621 }
 0x3e0   : > { %1025 = vperm.xlu0 %1616, %v1622_v49   ;;  %v1624_v63 = vpop.eup %1623 }
 0x44b   : > { %v993_v54 = vpop.permute.xlu1 %992 }
 0x44d   : > { %v989_v56 = vpop.permute.xlu0 %988 }
 0x45b   : > { %v1026_v26 = vpop.permute.xlu0 %1025 }
 0x45c   : > { %v1033_v27 = vmul.f32 %v1026_v26, %v1778_v42 }
 0x498   : > { %v1584_v55 = vpop.f32.mrf.mxu1 }
 0x499   : > { %vm996_vm8 = vcmp.gt.f32.partialorder %v993_v54, %v1584_v55  ;;  %vm998_vm9 = vcmp.eq.f32.partialorder %v993_v54, %v1584_v55 }
 0x49a   : > { %vm1002_vm11 = vmand %vm998_vm9, %vm1000_vm7  ;;  %v973_v57 = vpop.f32.mrf.mxu1 }
 0x49b   : > { %vm995_vm12 = vcmp.gt.f32.partialorder %v989_v56, %v973_v57  ;;  %vm997_vm13 = vcmp.eq.f32.partialorder %v989_v56, %v973_v57  ;;  %vm1004_vm14 = vmor %vm996_vm8, %vm1002_vm11 }
 0x49c   : > { %vm1001_vm15 = vmand %vm997_vm13, %vm999_vm10  ;;  %v1488_v61 = vsel %vm1004_vm14, 1.0, %v1637_v58  ;;  %vm1279_vm10 = vcmask 254080  }
 0x49d   : > { %vm1003_vm2 = vmor %vm995_vm12, %vm1001_vm15  ;;  %v1012_v62 = vsel %vm534_vm1, %v1488_v61, 0.0 }
 0x49e   : > { %v1487_v59 = vsel %vm1003_vm2, 1.0, %v1637_v58 }
 0x49f   : > { %v1009_v60 = vsel %vm534_vm1, %v1487_v59, 0.0 }
 0x4a0   : > { %1010 = vadd.xlane.f32.xlu1 %v1009_v60 }
 0x4a4   : > { %1013 = vadd.xlane.f32.xlu1 %v1012_v62 }
 0x4b5   : > { %1030 = vperm.xlu1 %1615, %v1624_v63  }
 0x529   : > { %v1011_v5 = vpop.xlane.xlu1 %1010 }
 0x52a   : > { %v1015_v7 = vsub.f32 15.0, %v1011_v5 }
 0x52c   : > { %vm1017_vm3 = vcmp.lt.f32.partialorder %v1015_v7, 8.0 }
 0x52d   : > { %v1019_v9 = vsel %vm1017_vm3, %v1713_v1, 0.0  ;;  %v1014_v10 = vpop.xlane.xlu1 %1013 }
 0x52e   : > { %1215 = vst.msk [vmem:[%s429_s30] sm:$0xff] %vm450_vm0, %v1019_v9  ;;  %v1016_v12 = vsub.f32 15.0, %v1014_v10  ;;  %1037 = vperm.xlu0 %1616, %v1019_v9   ;;  %1600 = vmatprep.mubr.msk.f32.mxu1 %vm450_vm0, %v1019_v9  ;;  %vm1243_vm6 = vcmp.gt.f32.partialorder %v1019_v9, 0.0  ;;  %v1217_v1 = vsel %vm450_vm0, %v1019_v9, 0.0 }
 0x52f   : > { %v1245_v16 = vsel %vm1243_vm6, 1, %v1635_v24 }
 0x530   : > { %vm1018_vm5 = vcmp.lt.f32.partialorder %v1016_v12, 8.0 }
 0x531   : > { %v1020_v13 = vsel %vm1018_vm5, %v1711_v0, 0.0  ;;  %v1031_v28 = vpop.permute.xlu1 %1030 }
 0x532   : > { %1216 = vst.msk [vmem:[%s429_s30 + $0x8] sm:$0xff] %vm450_vm0, %v1020_v13  ;;  %1042 = vperm.xlu0 %1616, %v1020_v13   ;;  %1596 = vmatprep.subr.msk.mxu1 %vm450_vm0, %v1020_v13  ;;  %v1218_v14 = vsel %vm450_vm0, %v1020_v13, 0.0  ;;  %vm1244_vm7 = vcmp.gt.f32.partialorder %v1020_v13, 0.0  ;;  %v1034_v31 = vmul.f32 %v1031_v28, %v1780_v43 }
 0x533   : > { %1597 = vmatpush3.xpose.msk.msra.mxu1 %vm450_vm0, %v1020_v13  ;;  %v1219_v15 = vadd.f32 %v1218_v14, %v1217_v1  ;;  %v1246_v18 = vsel %vm1244_vm7, 1, %v1635_v24 }
 0x534   : > { %1598 = vmatprep.subr.msk.mxu1 %vm450_vm0, %v1019_v9 }
 0x535   : > { %v1220_v17 = vrot.slane %v1219_v15, 4 }
 0x536   : > { %1248 = vperm.xlu0 %1616, %v1245_v16  }
 0x537   : > { %1599 = vmatpush3.xpose.msk.msra.mxu1 %vm450_vm0, %v1019_v9  ;;  %v1221_v0 = vadd.f32 %v1220_v17, %v1219_v15 }
 0x539   : > { %v1222_v19 = vrot.slane %v1221_v0, 2 }
 0x53a   : > { %1251 = vperm.xlu0 %1616, %v1246_v18   ;;  %1601 = vmatmul.mubr.msk.f32.vlgmr.msra.gmra.mxu1 %vm450_vm0, %v1020_v13 }
 0x53b   : > { %v1223_v20 = vadd.f32 %v1222_v19, %v1221_v0 }
 0x53d   : > { %v1224_v21 = vrot.slane %v1223_v20, 1 }
 0x53f   : > { %v1225_v22 = vadd.f32 %v1224_v21, %v1223_v20 }
 0x541   : > { %vm1266_vm8 = vcmp.gt.f32.partialorder %v1225_v22, 0.0  ;;  %v1235_v23 = vmax.f32 %v1225_v22, 1.0 }
 0x542   : > { %v1267_v25 = vsel %vm1266_vm8, 1, %v1635_v24 }
 0x543   : > { %1269 = vperm.xlu1 %1615, %v1267_v25   ;;  %1238 = vperm.xlu0 %1616, %v1235_v23  }
 0x5a9   : > { %v1038_v29 = vpop.permute.xlu0 %1037 }
 0x5aa   : > { %v1045_v30 = vmul.f32 %v1038_v29, %v1033_v27 }
 0x5ac   : > { %1593 = vmatprep.mubr.msk.f32.mxu0 %vm812_vm4, %v1045_v30 }
 0x5ad   : > { %v1043_v32 = vpop.permute.xlu0 %1042 }
 0x5ae   : > { %v1046_v33 = vmul.f32 %v1043_v32, %v1034_v31 }
 0x5b0   : > { %1594 = vmatmul.mubr.msk.f32.vlgmr.msra.gmra.mxu0 %vm812_vm4, %v1046_v33 }
 0x5b1   : > { %v1249_v37 = vpop.permute.xlu0 %1248 }
 0x5b2   : > { %vm1253_vm4 = vcmp.eq.s32.totalorder %v1249_v37, 1 }
 0x5b5   : > { %v1252_v38 = vpop.permute.xlu0 %1251 }
 0x5b6   : > { %vm1254_vm0 = vcmp.eq.s32.totalorder %v1252_v38, 1 }
 0x5be   : > { %v1239_v42 = vpop.permute.xlu0 %1238  ;;  %v1270_v59 = vpop.permute.xlu1 %1269 }
 0x5bf   : > { %1625 = vrcp.f32 %v1239_v42  ;;  %vm1271_vm9 = vcmp.eq.s32.totalorder %v1270_v59, 1 }
 0x5cc   : > { %v1626_v62 = vpop.eup %1625 }
 0x5fa   : > { %v1602_v24 = vpop.f32.mrf.mxu1 }
 0x5fb   : > { %v1210_v34 = vmul.f32 %v1602_v24, %v1731_v2 }
 0x5fc   : > { %v1200_v35 = vpop.f32.mrf.mxu1 }
 0x5fd   : > { %1212 = vst.msk [vmem:[%s419_s18 + $0x8] sm:$0xff] %vm534_vm1, %v1210_v34  ;;  %v1209_v36 = vmul.f32 %v1200_v35, %v1733_v4 }
 0x5ff   : > { %1211 = vst.msk [vmem:[%s419_s18] sm:$0xff] %vm534_vm1, %v1209_v36 }
 0x670   : > { %v1595_v39 = vpop.f32.mrf.mxu0 }
 0x671   : > { %v1129_v40 = vmul.f32 %v1595_v39, %v1043_v32 }
 0x672   : > { %v1119_v41 = vpop.f32.mrf.mxu0 }
 0x673   : > { %1214 = vst.msk [vmem:[%s424_s21 + $0x8] sm:$0xff] %vm534_vm1, %v1129_v40  ;;  %v1256_v2 = vsel %vm1254_vm0, %v1129_v40, -1e+30  ;;  %v1128_v43 = vmul.f32 %v1119_v41, %v1038_v29  ;;  %v1227_v4 = vsel %vm534_vm1, %v1129_v40, 0.0 }
 0x674   : > { %v1258_v46 = vsel %vm534_vm1, %v1256_v2, -inf }
 0x675   : > { %1213 = vst.msk [vmem:[%s424_s21] sm:$0xff] %vm534_vm1, %v1128_v43  ;;  %v1226_v44 = vsel %vm534_vm1, %v1128_v43, 0.0  ;;  %v1255_v45 = vsel %vm1253_vm4, %v1128_v43, -1e+30 }
 0x676   : > { %v1228_v47 = vadd.f32 %v1227_v4, %v1226_v44  ;;  %v1257_v48 = vsel %vm534_vm1, %v1255_v45, -inf  ;;  %vm1273_vm1 = vcmask 122880  }
 0x677   : > { %v1259_v49 = vmax.f32 %v1257_v48, %v1258_v46 }
 0x678   : > { %v1229_v50 = vrot.slane %v1228_v47, 4 }
 0x679   : > { %v1260_v51 = vrot.slane %v1259_v49, 4 }
 0x67a   : > { %v1230_v52 = vadd.f32 %v1229_v50, %v1228_v47 }
 0x67b   : > { %v1261_v53 = vmax.f32 %v1259_v49, %v1260_v51 }
 0x67c   : > { %v1231_v54 = vrot.slane %v1230_v52, 2 }
 0x67d   : > { %v1262_v55 = vrot.slane %v1261_v53, 2 }
 0x67e   : > { %v1232_v56 = vadd.f32 %v1231_v54, %v1230_v52 }
 0x67f   : > { %v1263_v57 = vmax.f32 %v1261_v53, %v1262_v55 }
 0x680   : > { %v1233_v58 = vrot.slane %v1232_v56, 1 }
 0x681   : > { %v1264_v60 = vrot.slane %v1263_v57, 1 }
 0x682   : > { %v1234_v61 = vadd.f32 %v1233_v58, %v1232_v56 }
 0x683   : > { %v1265_v63 = vmax.f32 %v1263_v57, %v1264_v60 }
 0x684   : > { %v1242_v3 = vmul.f32 %v1626_v62, %v1234_v61 }
 0x685   : > { %v1272_v5 = vsel %vm1271_vm9, %v1265_v63, 0.0 }
 0x686   : > { %1276 = vrot.lane.b32.xlu1 %v1272_v5, %s1638_s24  ;;  %1274 = vst.msk [vmem:[%s432_s23] sm:$0x1] %vm1273_vm1, %v1242_v3 }
 0x6f8   : > { %v1277_v6 = vpop.permute.xlu1 %1276 }
 0x6f9   : > { %1280 = vst.msk [vmem:[%s432_s23] sm:$0x1] %vm1279_vm10, %v1277_v6 }
 0x6fa PF: > { %s21_s13 = sadd.s32 1, %s1633_s13  }
 0x6fb   : > { %p18_p4 = scmp.ge.s32.totalorder %s21_s13, 4  }
 0x6fd   :  { %20 = sbr.rel (!%p18_p4) target bundleno = 1 (0x1), region = 120 }

// kernel: lugtp_forward.7
= control target key start
LH: loop header
LB: loop body
LE: loop exit
PB: predicated region body
PF: predicated region fallthrough
CT: control target
= control target key end

     0   :  { %v271_v2 = vmov 0.0   ;;  %vm123_vm0 = vcmask 130048   ;;  %s350_s0 = inlined_call_operand.vmem [shape: f32[2,32], index: 0, kind: input, shape index: {}]   ;;  %s351_s1 = inlined_call_operand.vmem [shape: f32[2,16], index: 1, kind: input, shape index: {}]   ;;  %s352_s2 = inlined_call_operand.vmem [shape: f32[2,8], index: 2, kind: input, shape index: {}]   ;;  %s353_s3 = inlined_call_operand.vmem [shape: f32[32,8], index: 3, kind: input, shape index: {}]   ;;  %s354_s4 = inlined_call_operand.vmem [shape: f32[1,8], index: 4, kind: input, shape index: {}]   ;;  %s355_s5 = inlined_call_operand.vmem [shape: f32[16,8], index: 5, kind: input, shape index: {}]   ;;  %s356_s6 = inlined_call_operand.vmem [shape: f32[1,8], index: 6, kind: input, shape index: {}]   ;;  %s357_s7 = inlined_call_operand.hbm [shape: f32[2,8], index: 7, kind: output, shape index: {}]  }
   0x1   :  { %v31_v0 = vld [vmem:[%s353_s3 + $0x18] sm:$0xff]  ;;  %v115_v1 = vld [vmem:[%s355_s5 + $0x8] sm:$0xff]  ;;  %228 = vmatprep.subr.mxu0 %v271_v2  ;;  %239 = vmatprep.subr.mxu1 %v271_v2  ;;  %v30_v3 = vld [vmem:[%s353_s3 + $0x10] sm:$0xff] }
   0x2   :  { %v114_v4 = vld [vmem:[%s355_s5] sm:$0xff]  ;;  %229 = vmatpush3.msra.mxu0 %v31_v0  ;;  %240 = vmatpush3.msra.mxu1 %v115_v1  ;;  %v29_v5 = vld [vmem:[%s353_s3 + $0x8] sm:$0xff] }
   0x3   :  { %230 = vmatprep.subr.mxu0 %v271_v2  ;;  %241 = vmatprep.subr.mxu1 %v271_v2  ;;  %v113_v6 = vld [vmem:[%s351_s1] sm:$0x3] }
   0x4   :  { %12 = vsyncpa [#allocation3], 0  ;;  %231 = vmatpush3.msra.mxu0 %v30_v3  ;;  %242 = vmatpush3.msra.mxu1 %v114_v4  ;;  %vm272_vm1 = vmmov 0   ;;  %v28_v7 = vld [vmem:[%s353_s3] sm:$0xff]  ;;  %vm39_vm2 = vcmask 261120   ;;  %s273_s19 = smov [#allocation2]  }
   0x5   :  { %232 = vmatprep.subr.mxu0 %v271_v2  ;;  %243 = vmatprep.mubr.msk.f32.mxu1 %vm272_vm1, %v271_v2  ;;  %v27_v8 = vld [vmem:[%s350_s0] sm:$0x3]  ;;  %s208_s20 = sshll.u32 %s273_s19, 4  ;;  %vm200_vm3 = vcmask 58368   ;;  %s209_s20 = int_to_ptr.vmem [resolvable:$true] %s208_s20 }
   0x6   :  { %233 = vmatpush3.msra.mxu0 %v29_v5  ;;  %244 = vmatmul.mubr.msk.f32.vlgmr.msra.gmra.mxu1 %vm123_vm0, %v113_v6  ;;  %v218_v9 = vld [vmem:[%s356_s6] ss:$0 sm:$0xff]  ;;  %s249_s6 = scalar_lea.vmem %s209_s20, 32  ;;  %p254_p1 = scmp.lt.s32.totalorder %s209_s20, %s209_s20 }
   0x7   :  { %234 = vmatprep.subr.mxu0 %v271_v2  ;;  %236 = vmatprep.mubr.msk.f32.mxu0 %vm272_vm1, %v271_v2  ;;  %v216_v11 = vld [vmem:[%s354_s4] ss:$0 sm:$0xff]  ;;  %p250_p0 = scmp.ne.s32.totalorder %s209_s20, %s249_s6  ;;  %p255_p2 = scmp.lt.s32.totalorder %s249_s6, %s249_s6 }
   0x8   :  { %235 = vmatpush3.msra.mxu0 %v28_v7  ;;  %v198_v17 = vld [vmem:[%s352_s2] sm:$0x3] }
   0x9   :  { %237 = vmatmul.mubr.msk.f32.vlgmr.msra.gmra.mxu0 %vm39_vm2, %v27_v8  ;;  %p256_p3 = por %p255_p2, %p254_p1 }
   0xb   :  { %p257_p4 = pnand %p256_p3, %p250_p0 }
  0xc6   :  { %v193_v10 = vpop.f32.mrf.mxu1 }
  0xc7   :  { %v194_v12 = vadd.f32 %v218_v9, %v193_v10 }
  0xc8   :  { %v245_v13 = vpop.f32.mrf.mxu1 }
  0xc9   :  { %v109_v14 = vpop.f32.mrf.mxu0 }
  0xca   :  { %v110_v15 = vadd.f32 %v216_v11, %v109_v14 }
  0xcb   :  { %v238_v16 = vpop.f32.mrf.mxu0 }
  0xcc   :  { %v197_v18 = vadd.f32 %v194_v12, %v110_v15 }
  0xce   :  { %v199_v19 = vadd.f32 %v198_v17, %v197_v18 }
  0xd0   :  { %201 = vst.msk [vmem:[#allocation2] sm:$0x3] %vm200_vm3, %v199_v19 }
  0xd1   :  { %260 = shalt.err (!%p257_p4)
}
  0xd2   :  { %211 = dma.vmem_to_hbm [thread:$0]  %s209_s20, 32, %s357_s7, [#allocation3]  }
  0xd3   :  { %269 = dma.done.wait [#allocation3], 32  }
  0xd4   :  { %270 = vsyncadd [#allocation3], 4294967264 }
  0xd5   :  { %215 = vsyncpa [#allocation3], 1 }

// kernel: lugtp_forward.5
= control target key start
LH: loop header
LB: loop body
LE: loop exit
PB: predicated region body
PF: predicated region fallthrough
CT: control target
= control target key end

     0   :  { %s1678_s13 = smov 0   ;;  %s1828_s0 = inlined_call_operand.vmem [shape: f32[2,16,16], index: 0, kind: input, shape index: {}]   ;;  %s1829_s1 = inlined_call_operand.vmem [shape: f32[2,16,16], index: 1, kind: input, shape index: {}]   ;;  %s1830_s2 = inlined_call_operand.vmem [shape: f32[2,16,1], index: 2, kind: input, shape index: {}]   ;;  %s1831_s3 = inlined_call_operand.vmem [shape: f32[16,16], index: 3, kind: input, shape index: {}]   ;;  %s1832_s4 = inlined_call_operand.vmem [shape: f32[1,16], index: 4, kind: input, shape index: {}]   ;;  %s1833_s5 = inlined_call_operand.vmem [shape: f32[16,1], index: 5, kind: input, shape index: {}]   ;;  %s1834_s6 = inlined_call_operand.vmem [shape: f32[16,8], index: 6, kind: input, shape index: {}]   ;;  %s1835_s7 = inlined_call_operand.vmem [shape: f32[2,16,16], index: 7, kind: output, shape index: {0}]   ;;  %s1836_s8 = inlined_call_operand.vmem [shape: f32[2,16,8], index: 8, kind: output, shape index: {1}]   ;;  %s1837_s9 = inlined_call_operand.vmem [shape: f32[2,16,1], index: 9, kind: output, shape index: {2}]   ;;  %s1838_s10 = inlined_call_operand.vmem [shape: f32[2,1,16], index: 10, kind: output, shape index: {3}]  }
   0x1 LB: > { %s1447_s14 = sadd.s32 4294967295, %s1617_s13   ;;  %p1451_p0 = scmp.ge.s32.totalorder %s1617_s13, 1  ;;  %s1617_s13 = sphi %s1678_s13, %s21_s13  }
   0x2   : > { %p339_p1 = scmp.lt.s32.totalorder %s1617_s13, 3 }
   0x4   : > { %p340_p2 = pnand %p1451_p0, %p339_p1 }
   0x5   : > { %p400_p3 = scmp.lt.s32.totalorder (!%p340_p2), %s1447_s14, 1  ;;  %s1622_s16 = smov (!%p340_p2), 8  }
   0x6   : > { %343 = sbr.rel (%p340_p2) target bundleno = 1789 (0x6fd), region = 48 }
   0xb   : > { %s1840_s14 = smov (!%p400_p3, %s1447_s14), 1  ;;  %vm446_vm0 = vcmask 7168   ;;  %vm530_vm1 = vcmask 130048   ;;  %v440_v18 = vld [vmem:[%s1831_s3 + $0x8] sm:$0xff]  ;;  %v439_v20 = vld [vmem:[%s1831_s3] sm:$0xff]  ;;  %v1619_v22 = vmov 0   ;;  %v977_v48 = vlaneseq }
   0xc   : > { %s1689_s15 = sshll.u32 %s1840_s14, 4  ;;  %1599 = vset.pattern.permute.xlu1 %v1619_v22  ;;  %1600 = vset.pattern.permute.xlu0 %v1619_v22  ;;  %v443_v29 = vld [vmem:[%s1833_s5 + $0x8] sm:$0xff]  ;;  %v442_v30 = vld [vmem:[%s1833_s5] sm:$0xff]  ;;  %v1620_v42 = vmov 1.0   ;;  %v1621_v56 = vmov 0.0   ;;  %s432_s12 = scalar_lea.vmem %s1838_s10, %s1840_s14 }
   0xd   : > { %s414_s18 = scalar_lea.vmem %s1830_s2, %s1689_s15  ;;  %s404_s21 = scalar_lea.vmem %s1828_s0, %s1689_s15  ;;  %v1474_v31 = vld [vmem:[%s1832_s4] ss:$0 sm:$0xff]  ;;  %v978_v49 = vshrl.u32 %v977_v48, 7  ;;  %v981_v51 = vand.u32 127, %v977_v48  ;;  %v445_v61 = vld [vmem:[%s1834_s6 + $0x8] sm:$0xff] }
   0xe   : > { %v1695_v0 = vld [vmem:[%s414_s18 + $0x8] sm:$0xff]  ;;  %v1697_v1 = vld [vmem:[%s414_s18] sm:$0xff]  ;;  %s409_s26 = scalar_lea.vmem %s1829_s1, %s1689_s15  ;;  %s429_s24 = scalar_lea.vmem %s1837_s9, %s1689_s15 }
   0xf   : > { %1531 = vmatprep.subr.msk.mxu0 %vm446_vm0, %v1695_v0  ;;  %1535 = vmatprep.mubr.msk.f32.mxu0 %vm446_vm0, %v1697_v1  ;;  %v1715_v2 = vld [vmem:[%s404_s21 + $0x8] sm:$0xff]  ;;  %v1717_v4 = vld [vmem:[%s404_s21] sm:$0xff]  ;;  %vm890_vm4 = vcmp.gt.f32.partialorder %v1695_v0, 0.0  ;;  %vm889_vm5 = vcmp.gt.f32.partialorder %v1697_v1, 0.0  ;;  %v979_v50 = vadd.s32 8, %v978_v49  ;;  %vm994_vm9 = vcmp.lt.s32.totalorder %v978_v49, %v981_v51  ;;  %s424_s27 = scalar_lea.vmem %s1836_s8, %s1689_s15  ;;  %s419_s30 = scalar_lea.vmem %s1835_s7, %s1689_s15 }
  0x10   : > { %1532 = vmatpush3.xpose.msk.msra.mxu0 %vm446_vm0, %v1695_v0  ;;  %v435_v19 = vld [vmem:[%s409_s26] sm:$0xff]  ;;  %v436_v21 = vld [vmem:[%s409_s26 + $0x8] sm:$0xff]  ;;  %799 = vperm.xlu1 %1599, %v1697_v1  }
  0x11   : > { %1533 = vmatprep.subr.msk.mxu0 %vm446_vm0, %v1697_v1  ;;  %vm995_vm6 = vcmp.lt.s32.totalorder %v979_v50, %v981_v51  ;;  %v444_v62 = vld [vmem:[%s1834_s6] sm:$0xff] }
  0x14   : > { %1534 = vmatpush3.xpose.msk.msra.mxu0 %vm446_vm0, %v1697_v1  ;;  %803 = vperm.xlu1 %1599, %v1695_v0  }
  0x15   : > { %1559 = vmatprep.subr.mxu0 %v443_v29 }
  0x17   : > { %1536 = vmatmul.mubr.msk.f32.vlgmr.msra.gmra.mxu0 %vm446_vm0, %v1695_v0 }
  0x18   : > { %1560 = vmatpush3.msra.mxu0 %v443_v29 }
  0x19   : > { %1561 = vmatprep.subr.mxu0 %v442_v30 }
  0x1a   : > { %1562 = vmatpush3.msra.mxu0 %v442_v30 }
  0x1b   : > { %1573 = vmatprep.subr.mxu0 %v445_v61 }
  0x8b   : > { %v800_v32 = vpop.permute.xlu1 %799 }
  0x8f   : > { %v804_v39 = vpop.permute.xlu1 %803 }
  0xd7   : > { %v1537_v3 = vpop.f32.mrf.mxu0 }
  0xd8   : > { %v529_v5 = vmul.f32 %v1537_v3, %v1715_v2 }
  0xd9   : > { %v519_v6 = vpop.f32.mrf.mxu0 }
  0xda   : > { %v528_v7 = vmul.f32 %v519_v6, %v1717_v4  ;;  %v534_v8 = vsel %vm530_vm1, %v529_v5, 0.0 }
  0xdb   : > { %535 = vadd.xlane.f32.xlu0 %v534_v8 }
  0xdc   : > { %v531_v9 = vsel %vm530_vm1, %v528_v7, 0.0 }
  0xdf   : > { %532 = vadd.xlane.f32.xlu0 %v531_v9 }
 0x164   : > { %v536_v10 = vpop.xlane.xlu0 %535 }
 0x165   : > { %v540_v11 = vmax.f32 %v536_v10, 1e-12  ;;  %vm538_vm2 = vcmp.gt.f32.partialorder %v536_v10, 0.0 }
 0x167   : > { %1601 = vrsqrt.f32 %v540_v11 }
 0x168   : > { %v533_v12 = vpop.xlane.xlu0 %532 }
 0x169   : > { %v539_v13 = vmax.f32 %v533_v12, 1e-12  ;;  %vm537_vm3 = vcmp.gt.f32.partialorder %v533_v12, 0.0 }
 0x16b   : > { %1603 = vrsqrt.f32 %v539_v13 }
 0x174   : > { %v1602_v14 = vpop.eup %1601 }
 0x175   : > { %v544_v15 = vsel %vm538_vm2, %v1602_v14, 0.0 }
 0x176   : > { %1538 = vmatprep.subr.msk.mxu1 %vm446_vm0, %v544_v15 }
 0x177   : > { %1539 = vmatpush3.xpose.msk.msra.mxu1 %vm446_vm0, %v544_v15 }
 0x178   : > { %v1604_v16 = vpop.eup %1603 }
 0x179   : > { %v543_v17 = vsel %vm537_vm3, %v1604_v16, 0.0 }
 0x17a   : > { %1540 = vmatprep.subr.msk.mxu1 %vm446_vm0, %v543_v17  ;;  %1542 = vmatprep.mubr.msk.f32.mxu1 %vm446_vm0, %v543_v17 }
 0x17b   : > { %1541 = vmatpush3.xpose.msk.msra.mxu1 %vm446_vm0, %v543_v17 }
 0x17c   : > { %1545 = vmatprep.subr.mxu1 %v440_v18 }
 0x17e   : > { %1543 = vmatmul.mubr.msk.f32.vlgmr.msra.gmra.mxu1 %vm446_vm0, %v544_v15 }
 0x17f   : > { %1546 = vmatpush3.msra.mxu1 %v440_v18  ;;  %1549 = vmatprep.mubr.msk.f32.mxu1 %vm530_vm1, %v435_v19 }
 0x180   : > { %1547 = vmatprep.subr.mxu1 %v439_v20 }
 0x181   : > { %1548 = vmatpush3.msra.mxu1 %v439_v20 }
 0x182   : > { %1550 = vmatmul.mubr.msk.f32.vlgmr.msra.gmra.mxu1 %vm530_vm1, %v436_v21 }
 0x23e   : > { %v1544_v23 = vpop.f32.mrf.mxu1 }
 0x23f   : > { %v627_v28 = vmul.f32 %v1544_v23, %v529_v5 }
 0x240   : > { %v617_v24 = vpop.f32.mrf.mxu1 }
 0x241   : > { %v626_v25 = vmul.f32 %v617_v24, %v528_v7 }
 0x242   : > { %v1551_v26 = vpop.f32.mrf.mxu1 }
 0x243   : > { %1552 = vmatprep.subr.mxu1 %v1551_v26  ;;  %1556 = vmatprep.mubr.msk.f32.mxu1 %vm530_vm1, %v626_v25 }
 0x244   : > { %v700_v27 = vpop.f32.mrf.mxu1  ;;  %1553 = vmatpush3.msra.mxu1 %v1551_v26 }
 0x245   : > { %1554 = vmatprep.subr.mxu1 %v700_v27 }
 0x246   : > { %1555 = vmatpush3.msra.mxu1 %v700_v27 }
 0x247   : > { %1557 = vmatmul.mubr.msk.f32.vlgmr.msra.gmra.mxu1 %vm530_vm1, %v627_v28 }
 0x248   : > { %1570 = vmatprep.mubr.msk.f32.mxu1 %vm446_vm0, %v1620_v42 }
 0x307   : > { %v1558_v33 = vpop.f32.mrf.mxu1 }
 0x308   : > { %v793_v34 = vadd.f32 %v1558_v33, %v1474_v31 }
 0x309   : > { %v787_v35 = vpop.f32.mrf.mxu1 }
 0x30a   : > { %v788_v36 = vadd.f32 %v1474_v31, %v787_v35  ;;  %v797_v37 = vmax.f32 %v793_v34, 0.0 }
 0x30c   : > { %v796_v38 = vmax.f32 %v788_v36, 0.0  ;;  %v1758_v41 = vmul.f32 %v804_v39, %v797_v37 }
 0x30e   : > { %v1756_v40 = vmul.f32 %v800_v32, %v796_v38 }
 0x310   : > { %1563 = vmatprep.mubr.msk.f32.mxu0 %vm530_vm1, %v1756_v40 }
 0x311   : > { %1564 = vmatmul.mubr.msk.f32.vlgmr.msra.gmra.mxu0 %vm530_vm1, %v1758_v41 }
 0x312   : > { %1574 = vmatpush3.msra.mxu0 %v445_v61 }
 0x313   : > { %1575 = vmatprep.subr.mxu0 %v444_v62 }
 0x314   : > { %1576 = vmatpush3.msra.mxu0 %v444_v62 }
 0x3d1   : > { %v1565_v43 = vpop.f32.mrf.mxu0 }
 0x3d2   : > { %v892_v44 = vsel %vm890_vm4, %v1565_v43, -1e+30 }
 0x3d3   : > { %987 = vperm.xlu1 %1599, %v892_v44   ;;  %v880_v45 = vpop.f32.mrf.mxu0  ;;  %1566 = vmatprep.subr.msk.mxu1 %vm446_vm0, %v892_v44 }
 0x3d4   : > { %v891_v46 = vsel %vm889_vm5, %v880_v45, -1e+30  ;;  %1567 = vmatpush3.xpose.msk.msra.mxu1 %vm446_vm0, %v892_v44 }
 0x3d5   : > { %1605 = vtanh.f32 %v891_v46  ;;  %983 = vperm.xlu0 %1600, %v891_v46   ;;  %1568 = vmatprep.subr.msk.mxu1 %vm446_vm0, %v891_v46 }
 0x3d6   : > { %1607 = vtanh.f32 %v892_v44 }
 0x3d8   : > { %1569 = vmatpush3.xpose.msk.msra.mxu1 %vm446_vm0, %v891_v46 }
 0x3db   : > { %1571 = vmatmul.mubr.msk.f32.vlgmr.msra.gmra.mxu1 %vm446_vm0, %v1620_v42 }
 0x3e2   : > { %v1606_v47 = vpop.eup %1605 }
 0x3e3   : > { %1020 = vperm.xlu0 %1600, %v1606_v47   ;;  %v1608_v63 = vpop.eup %1607 }
 0x44e   : > { %v988_v52 = vpop.permute.xlu1 %987 }
 0x450   : > { %v984_v54 = vpop.permute.xlu0 %983 }
 0x45e   : > { %v1021_v21 = vpop.permute.xlu0 %1020 }
 0x45f   : > { %v1028_v23 = vmul.f32 %v1021_v21, %v1756_v40 }
 0x49b   : > { %v1572_v53 = vpop.f32.mrf.mxu1 }
 0x49c   : > { %vm991_vm7 = vcmp.gt.f32.partialorder %v988_v52, %v1572_v53  ;;  %vm993_vm8 = vcmp.eq.f32.partialorder %v988_v52, %v1572_v53 }
 0x49d   : > { %vm997_vm10 = vmand %vm993_vm8, %vm995_vm6  ;;  %v968_v55 = vpop.f32.mrf.mxu1 }
 0x49e   : > { %vm990_vm11 = vcmp.gt.f32.partialorder %v984_v54, %v968_v55  ;;  %vm992_vm12 = vcmp.eq.f32.partialorder %v984_v54, %v968_v55  ;;  %vm999_vm13 = vmor %vm991_vm7, %vm997_vm10  ;;  %vm1208_vm7 = vcmask 64512  }
 0x49f   : > { %vm996_vm14 = vmand %vm992_vm12, %vm994_vm9  ;;  %v1484_v59 = vsel %vm999_vm13, 1.0, %v1621_v56 }
 0x4a0   : > { %vm998_vm15 = vmor %vm990_vm11, %vm996_vm14  ;;  %v1007_v60 = vsel %vm530_vm1, %v1484_v59, 0.0 }
 0x4a1   : > { %v1483_v57 = vsel %vm998_vm15, 1.0, %v1621_v56 }
 0x4a2   : > { %v1004_v58 = vsel %vm530_vm1, %v1483_v57, 0.0 }
 0x4a3   : > { %1005 = vadd.xlane.f32.xlu1 %v1004_v58 }
 0x4a7   : > { %1008 = vadd.xlane.f32.xlu1 %v1007_v60 }
 0x4b8   : > { %1025 = vperm.xlu1 %1599, %v1608_v63  }
 0x52c   : > { %v1006_v3 = vpop.xlane.xlu1 %1005 }
 0x52d   : > { %v1010_v5 = vsub.f32 15.0, %v1006_v3 }
 0x52f   : > { %vm1012_vm2 = vcmp.lt.f32.partialorder %v1010_v5, 4.0 }
 0x530   : > { %v1014_v6 = vsel %vm1012_vm2, %v1697_v1, 0.0  ;;  %v1009_v7 = vpop.xlane.xlu1 %1008 }
 0x531   : > { %1211 = vst.msk [vmem:[%s429_s24] sm:$0xff] %vm446_vm0, %v1014_v6  ;;  %v1011_v8 = vsub.f32 15.0, %v1009_v7  ;;  %1032 = vperm.xlu0 %1600, %v1014_v6   ;;  %vm1239_vm4 = vcmp.gt.f32.partialorder %v1014_v6, 0.0  ;;  %v1213_v10 = vsel %vm446_vm0, %v1014_v6, 0.0 }
 0x532   : > { %v1241_v1 = vsel %vm1239_vm4, 1, %v1619_v22 }
 0x533   : > { %vm1013_vm3 = vcmp.lt.f32.partialorder %v1011_v8, 4.0 }
 0x534   : > { %v1015_v9 = vsel %vm1013_vm3, %v1695_v0, 0.0  ;;  %v1026_v24 = vpop.permute.xlu1 %1025 }
 0x535   : > { %1212 = vst.msk [vmem:[%s429_s24 + $0x8] sm:$0xff] %vm446_vm0, %v1015_v9  ;;  %1037 = vperm.xlu0 %1600, %v1015_v9   ;;  %1580 = vmatprep.subr.msk.mxu0 %vm446_vm0, %v1015_v9  ;;  %v1214_v11 = vsel %vm446_vm0, %v1015_v9, 0.0  ;;  %vm1240_vm5 = vcmp.gt.f32.partialorder %v1015_v9, 0.0  ;;  %v1029_v27 = vmul.f32 %v1026_v24, %v1758_v41 }
 0x536   : > { %v1215_v12 = vadd.f32 %v1214_v11, %v1213_v10  ;;  %v1242_v15 = vsel %vm1240_vm5, 1, %v1619_v22 }
 0x538   : > { %v1216_v13 = vrot.slane %v1215_v12, 4 }
 0x539   : > { %1244 = vperm.xlu0 %1600, %v1241_v1  }
 0x53a   : > { %v1217_v14 = vadd.f32 %v1216_v13, %v1215_v12 }
 0x53c   : > { %v1218_v0 = vrot.slane %v1217_v14, 2 }
 0x53d   : > { %1247 = vperm.xlu0 %1600, %v1242_v15  }
 0x53e   : > { %v1219_v16 = vadd.f32 %v1218_v0, %v1217_v14 }
 0x540   : > { %v1220_v17 = vrot.slane %v1219_v16, 1 }
 0x542   : > { %v1221_v18 = vadd.f32 %v1220_v17, %v1219_v16 }
 0x544   : > { %vm1262_vm6 = vcmp.gt.f32.partialorder %v1221_v18, 0.0  ;;  %v1231_v19 = vmax.f32 %v1221_v18, 1.0 }
 0x545   : > { %v1263_v20 = vsel %vm1262_vm6, 1, %v1619_v22 }
 0x546   : > { %1265 = vperm.xlu1 %1599, %v1263_v20   ;;  %1234 = vperm.xlu0 %1600, %v1231_v19  }
 0x5ac   : > { %v1033_v25 = vpop.permute.xlu0 %1032 }
 0x5ad   : > { %v1040_v26 = vmul.f32 %v1033_v25, %v1028_v23 }
 0x5af   : > { %1577 = vmatprep.mubr.msk.f32.mxu0 %vm530_vm1, %v1040_v26 }
 0x5b0   : > { %v1038_v28 = vpop.permute.xlu0 %1037 }
 0x5b1   : > { %v1041_v29 = vmul.f32 %v1038_v28, %v1029_v27 }
 0x5b3   : > { %1578 = vmatmul.mubr.msk.f32.vlgmr.msra.gmra.mxu0 %vm530_vm1, %v1041_v29 }
 0x5b4   : > { %1581 = vmatpush3.xpose.msk.msra.mxu0 %vm446_vm0, %v1015_v9  ;;  %1584 = vmatprep.mubr.msk.f32.mxu0 %vm446_vm0, %v1014_v6  ;;  %v1245_v22 = vpop.permute.xlu0 %1244 }
 0x5b5   : > { %1582 = vmatprep.subr.msk.mxu0 %vm446_vm0, %v1014_v6  ;;  %vm1249_vm9 = vcmp.eq.s32.totalorder %v1245_v22, 1 }
 0x5b8   : > { %1583 = vmatpush3.xpose.msk.msra.mxu0 %vm446_vm0, %v1014_v6  ;;  %v1248_v30 = vpop.permute.xlu0 %1247 }
 0x5b9   : > { %vm1250_vm8 = vcmp.eq.s32.totalorder %v1248_v30, 1 }
 0x5bb   : > { %1585 = vmatmul.mubr.msk.f32.vlgmr.msra.gmra.mxu0 %vm446_vm0, %v1015_v9  ;;  %vm1269_vm0 = vcmask 57344  }
 0x5c1   : > { %v1235_v34 = vpop.permute.xlu0 %1234  ;;  %v1266_v57 = vpop.permute.xlu1 %1265 }
 0x5c2   : > { %1609 = vrcp.f32 %v1235_v34  ;;  %vm1267_vm10 = vcmp.eq.s32.totalorder %v1266_v57, 1 }
 0x5cf   : > { %v1610_v60 = vpop.eup %1609 }
 0x673   : > { %v1579_v31 = vpop.f32.mrf.mxu0 }
 0x674   : > { %v1124_v32 = vmul.f32 %v1579_v31, %v1038_v28 }
 0x675   : > { %v1114_v33 = vpop.f32.mrf.mxu0 }
 0x676   : > { %1210 = vst.msk [vmem:[%s424_s27 + $0x8] sm:$0xff] %vm1208_vm7, %v1124_v32  ;;  %v1252_v35 = vsel %vm1250_vm8, %v1124_v32, -1e+30  ;;  %v1123_v36 = vmul.f32 %v1114_v33, %v1033_v25  ;;  %v1223_v37 = vsel %vm1208_vm7, %v1124_v32, 0.0 }
 0x677   : > { %v1254_v40 = vsel %vm1208_vm7, %v1252_v35, -inf }
 0x678   : > { %1209 = vst.msk [vmem:[%s424_s27] sm:$0xff] %vm1208_vm7, %v1123_v36  ;;  %v1222_v38 = vsel %vm1208_vm7, %v1123_v36, 0.0  ;;  %v1251_v39 = vsel %vm1249_vm9, %v1123_v36, -1e+30 }
 0x679   : > { %v1224_v41 = vadd.f32 %v1223_v37, %v1222_v38  ;;  %v1253_v42 = vsel %vm1208_vm7, %v1251_v39, -inf }
 0x67a   : > { %v1255_v43 = vmax.f32 %v1253_v42, %v1254_v40 }
 0x67b   : > { %v1225_v44 = vrot.slane %v1224_v41, 4  ;;  %v1586_v45 = vpop.f32.mrf.mxu0 }
 0x67c   : > { %v1256_v46 = vrot.slane %v1255_v43, 4  ;;  %v1205_v47 = vmul.f32 %v1586_v45, %v1715_v2 }
 0x67d   : > { %v1226_v48 = vadd.f32 %v1225_v44, %v1224_v41  ;;  %v1195_v49 = vpop.f32.mrf.mxu0 }
 0x67e   : > { %1207 = vst.msk [vmem:[%s419_s30 + $0x8] sm:$0xff] %vm530_vm1, %v1205_v47  ;;  %v1204_v50 = vmul.f32 %v1195_v49, %v1717_v4  ;;  %v1257_v51 = vmax.f32 %v1255_v43, %v1256_v46 }
 0x67f   : > { %v1227_v52 = vrot.slane %v1226_v48, 2 }
 0x680   : > { %1206 = vst.msk [vmem:[%s419_s30] sm:$0xff] %vm530_vm1, %v1204_v50  ;;  %v1258_v53 = vrot.slane %v1257_v51, 2  ;;  %vm1275_vm1 = vcmask 122944  }
 0x681   : > { %v1228_v54 = vadd.f32 %v1227_v52, %v1226_v48 }
 0x682   : > { %v1259_v55 = vmax.f32 %v1257_v51, %v1258_v53 }
 0x683   : > { %v1229_v56 = vrot.slane %v1228_v54, 1 }
 0x684   : > { %v1260_v58 = vrot.slane %v1259_v55, 1 }
 0x685   : > { %v1230_v59 = vadd.f32 %v1229_v56, %v1228_v54 }
 0x686   : > { %v1261_v2 = vmax.f32 %v1259_v55, %v1260_v58 }
 0x687   : > { %v1238_v4 = vmul.f32 %v1610_v60, %v1230_v59 }
 0x688   : > { %v1268_v61 = vsel %vm1267_vm10, %v1261_v2, 0.0 }
 0x689   : > { %1272 = vrot.lane.b32.xlu1 %v1268_v61, %s1622_s16  ;;  %1270 = vst.msk [vmem:[%s432_s12] sm:$0x1] %vm1269_vm0, %v1238_v4 }
 0x6fb   : > { %v1273_v62 = vpop.permute.xlu1 %1272 }
 0x6fc   : > { %1276 = vst.msk [vmem:[%s432_s12] sm:$0x1] %vm1275_vm1, %v1273_v62 }
 0x6fd PF: > { %s21_s13 = sadd.s32 1, %s1617_s13  }
 0x6fe   : > { %p18_p4 = scmp.ge.s32.totalorder %s21_s13, 4  }
 0x700   :  { %20 = sbr.rel (!%p18_p4) target bundleno = 1 (0x1), region = 120 }

// kernel: lugtp_forward.6
= control target key start
LH: loop header
LB: loop body
LE: loop exit
PB: predicated region body
PF: predicated region fallthrough
CT: control target
= control target key end

     0   :  { %s2189_s0 = inlined_call_operand.vmem [shape: f32[2,16,16], index: 0, kind: input, shape index: {}]   ;;  %s2190_s1 = inlined_call_operand.vmem [shape: f32[2,16,8], index: 1, kind: input, shape index: {}]   ;;  %s2191_s2 = inlined_call_operand.vmem [shape: f32[2,16,1], index: 2, kind: input, shape index: {}]   ;;  %s2192_s3 = inlined_call_operand.vmem [shape: f32[8,8], index: 3, kind: input, shape index: {}]   ;;  %s2193_s4 = inlined_call_operand.vmem [shape: f32[1,8], index: 4, kind: input, shape index: {}]   ;;  %s2194_s5 = inlined_call_operand.vmem [shape: f32[8,1], index: 5, kind: input, shape index: {}]   ;;  %s2195_s6 = inlined_call_operand.vmem [shape: f32[8,4], index: 6, kind: input, shape index: {}]   ;;  %s2196_s7 = inlined_call_operand.hbm [shape: f32[2,16,16], index: 7, kind: output, shape index: {0}]   ;;  %s2197_s8 = inlined_call_operand.hbm [shape: f32[2,16,4], index: 8, kind: output, shape index: {1}]   ;;  %s2198_s9 = inlined_call_operand.hbm [shape: f32[2,16,1], index: 9, kind: output, shape index: {2}]   ;;  %s2199_s10 = inlined_call_operand.vmem [shape: f32[2,1,8], index: 10, kind: output, shape index: {3}]  }
   0x1   :  { %2204 = sst [smem:[#allocation9_spill]] %s2189_s0 }
   0x2   :  { %2205 = sst [smem:[#allocation10_spill]] %s2190_s1 }
   0x3   :  { %2206 = sst [smem:[#allocation11_spill]] %s2191_s2 }
   0x4   :  { %2207 = sst [smem:[#allocation12_spill]] %s2192_s3 }
   0x5   :  { %2208 = sst [smem:[#allocation13_spill]] %s2193_s4 }
   0x6   :  { %16 = vsyncpa [#allocation3], 0 }
   0x7   :  { %18 = vsyncpa [#allocation3 + $0x1], 0 }
   0x8   :  { %19 = vsyncpa [#allocation5], 0 }
   0x9   :  { %21 = vsyncpa [#allocation5 + $0x1], 0  ;;  %s1879_s13 = smov 0   ;;  %s1881_s14 = smov 0  }
   0xa   :  { %s1883_s15 = smov 0   ;;  %s1885_s16 = smov 0  }
   0xb LB: > { %s1900_s17 = sadd.s32 4294967295, %s1813_s16   ;;  %s2200_s18 = sadd.s32 4294967294, %s1813_s16   ;;  %s1813_s16 = sphi %s1885_s16, %s2222_s16   ;;  %s1809_s15 = sphi %s1883_s15, %s2221_s15   ;;  %s1805_s14 = sphi %s1881_s14, %s2220_s14   ;;  %s1801_s13 = sphi %s1879_s13, %s2219_s13  }
   0xc   : > { %s1904_s19 = sadd.s32 1, %s1813_s16   ;;  %s196_s20 = sadd.s32 1, %s1809_s15 }
   0xd   : > { %s193_s21 = ssub.s32 %s1813_s16, %s1904_s19  ;;  %p206_p0 = scmp.ne.s32.totalorder %s1809_s15, %s1805_s14 }
   0xe   : > { %p194_p1 = scmp.eq.s32.totalorder %s193_s21, 0  ;;  %p207_p2 = scmp.eq.s32.totalorder %s1900_s17, 1 }
   0xf   : > { %p212_p3 = scmp.ne.s32.totalorder %s1805_s14, %s1801_s13  ;;  %p213_p4 = scmp.eq.s32.totalorder %s2200_s18, 1 }
  0x10   : > { %s1917_s22 = scalar_select %p194_p1, %s1809_s15, %s196_s20  }
  0x11   : > { %p1919_p5 = por %p207_p2, %p206_p0  ;;  %p1923_p6 = por %p213_p4, %p212_p3 }
  0x12   : > { %p1497_p7 = scmp.ge.s32.totalorder %s1813_s16, 1  ;;  %p345_p8 = scmp.lt.s32.totalorder %s1813_s16, 3 }
  0x14   : > { %p346_p9 = pnand %p1497_p7, %p345_p8 }
  0x15   : > { %p406_p10 = scmp.lt.s32.totalorder (!%p346_p9), %s1900_s17, 1  ;;  %s2211_s2 = sld [smem:[#allocation11_spill]] (!%p346_p9) }
  0x16   : > { %349 = sbr.rel (%p346_p9) target bundleno = 1859 (0x743), region = 48  ;;  %s2212_s0 = sld [smem:[#allocation9_spill]] (!%p346_p9) }
  0x17   : > { %s2213_s3 = sld [smem:[#allocation12_spill]] (!%p346_p9)  ;;  %s2201_s27 = sand.u32 (!%p346_p9), 1, %s1805_s14  }
  0x18   : > { %s2214_s1 = sld [smem:[#allocation10_spill]] (!%p346_p9)  ;;  %s2019_s28 = sshll.u32 (!%p346_p9), %s2201_s27, 4 }
  0x19   : > { %s2215_s4 = sld [smem:[#allocation13_spill]] (!%p346_p9)  ;;  %s1271_s21 = sand.u32 (!%p346_p9), 1, %s1900_s17  }
  0x1a   : > { %s2074_s27 = scalar_lea.sflag (!%p346_p9), [#allocation5], %s1271_s21 }
  0x1b   : > { %s1931_s25 = scalar_select %p406_p10, %s1900_s17, 1  ;;  %vm434_vm0 = vcmask 7168   ;;  %vm518_vm1 = vcmask 130048   ;;  %vm616_vm4 = vcmask 64512   ;;  %v1815_v21 = vmov 0   ;;  %v432_v28 = vld [vmem:[%s2194_s5] sm:$0xff] }
  0x1c   : > { %1685 = vset.pattern.permute.xlu1 %v1815_v21  ;;  %1686 = vset.pattern.permute.xlu0 %v1815_v21  ;;  %v1816_v40 = vmov 1.0   ;;  %v966_v46 = vlaneseq  ;;  %v1817_v54 = vmov 0.0   ;;  %v433_v59 = vld [vmem:[%s2195_s6] sm:$0xff] }
  0x1d   : > { %s1934_s26 = sshll.u32 %s1931_s25, 4  ;;  %v430_v18 = vld [vmem:[%s2213_s3] sm:$0xff] }
  0x1e   : > { %s420_s29 = scalar_lea.vmem %s2211_s2, %s1934_s26  ;;  %s410_s12 = scalar_lea.vmem %s2212_s0, %s1934_s26  ;;  %v967_v47 = vshrl.u32 %v966_v46, 7  ;;  %v970_v49 = vand.u32 127, %v966_v46 }
  0x1f   : > { %v1940_v0 = vld [vmem:[%s420_s29 + $0x8] sm:$0xff]  ;;  %v1942_v1 = vld [vmem:[%s420_s29] sm:$0xff]  ;;  %s415_s29 = scalar_lea.vmem %s2214_s1, %s1934_s26  ;;  %s393_s26 = scalar_lea.vmem [#allocation4], %s2019_s28 }
  0x20   : > { %1580 = vmatprep.subr.msk.mxu0 %vm434_vm0, %v1940_v0  ;;  %1584 = vmatprep.mubr.msk.f32.mxu0 %vm434_vm0, %v1942_v1  ;;  %v1960_v2 = vld [vmem:[%s410_s12 + $0x8] sm:$0xff]  ;;  %v1962_v4 = vld [vmem:[%s410_s12] sm:$0xff]  ;;  %vm879_vm5 = vcmp.gt.f32.partialorder %v1940_v0, 0.0  ;;  %vm878_vm6 = vcmp.gt.f32.partialorder %v1942_v1, 0.0  ;;  %v968_v48 = vadd.s32 8, %v967_v47  ;;  %vm983_vm10 = vcmp.lt.s32.totalorder %v967_v47, %v970_v49  ;;  %s1309_s30 = sshll.u32 %s393_s26, 4  ;;  %s2053_s30 = int_to_ptr.vmem [resolvable:$true] %s1309_s30 }
  0x21   : > { %1581 = vmatpush3.xpose.msk.msra.mxu0 %vm434_vm0, %v1940_v0  ;;  %v426_v19 = vld [vmem:[%s415_s29] sm:$0xff]  ;;  %v427_v20 = vld [vmem:[%s415_s29 + $0x8] sm:$0xff]  ;;  %788 = vperm.xlu1 %1685, %v1942_v1   ;;  %s2023_s29 = scalar_lea.vmem [#allocation6], %s2019_s28  ;;  %s2049_s12 = scalar_lea.vmem [#allocation2], %s2019_s28 }
  0x22   : > { %1582 = vmatprep.subr.msk.mxu0 %vm434_vm0, %v1942_v1  ;;  %v1517_v29 = vld [vmem:[%s2215_s4] ss:$0 sm:$0xff]  ;;  %vm984_vm7 = vcmp.lt.s32.totalorder %v968_v48, %v970_v49  ;;  %s1325_s11 = sshll.u32 %s2023_s29, 4  ;;  %s1293_s20 = sshll.u32 %s2049_s12, 4  ;;  %s2058_s11 = int_to_ptr.vmem [resolvable:$true] %s1325_s11  ;;  %s2061_s20 = int_to_ptr.vmem [resolvable:$true] %s1293_s20 }
  0x23   : > { %s2065_s28 = sshll.u32 %s1900_s17, 8  ;;  %s1697_s0 = scalar_lea.vmem %s2053_s30, 256 }
  0x24   : > { %s2072_s18 = scalar_lea.hbm %s2197_s8, %s2065_s28  ;;  %p1698_p11 = scmp.ne.s32.totalorder %s2053_s30, %s1697_s0 }
  0x25   : > { %1583 = vmatpush3.xpose.msk.msra.mxu0 %vm434_vm0, %v1942_v1  ;;  %792 = vperm.xlu1 %1685, %v1940_v0   ;;  %s1818_s17 = smov [#allocation4]  }
  0x26   : > { %1606 = vmatprep.subr.mxu0 %v432_v28  ;;  %p1699_p12 = pnand %p1698_p11, %p1919_p5  ;;  %s1701_s1 = sshll.u32 %s1818_s17, 4  ;;  %s1702_s1 = int_to_ptr.vmem [resolvable:$false] %s1701_s1 }
  0x27   : > { %s1703_s2 = scalar_lea.vmem %s1702_s1, 512  ;;  %p1704_p0 = scmp.lt.s32.totalorder %s2053_s30, %s1702_s1 }
  0x28   : > { %1585 = vmatmul.mubr.msk.f32.vlgmr.msra.gmra.mxu0 %vm434_vm0, %v1940_v0  ;;  %p1700_p13 = pneg %p1699_p12  ;;  %p1705_p1 = scmp.lt.s32.totalorder %s1703_s2, %s1697_s0 }
  0x29   : > { %1607 = vmatpush3.msra.mxu0 %v432_v28 }
  0x2a   : > { %1618 = vmatprep.subr.mxu0 %v433_v59  ;;  %p1706_p2 = por %p1705_p1, %p1704_p0 }
  0x2c   : > { %p1707_p3 = pnand %p1706_p2, %p1700_p13 }
  0x9c   : > { %v789_v30 = vpop.permute.xlu1 %788 }
  0xa0   : > { %v793_v37 = vpop.permute.xlu1 %792 }
  0xe8   : > { %v1586_v3 = vpop.f32.mrf.mxu0 }
  0xe9   : > { %v517_v5 = vmul.f32 %v1586_v3, %v1960_v2 }
  0xea   : > { %v507_v6 = vpop.f32.mrf.mxu0 }
  0xeb   : > { %v516_v7 = vmul.f32 %v507_v6, %v1962_v4  ;;  %v522_v8 = vsel %vm518_vm1, %v517_v5, 0.0 }
  0xec   : > { %523 = vadd.xlane.f32.xlu0 %v522_v8 }
  0xed   : > { %v519_v9 = vsel %vm518_vm1, %v516_v7, 0.0 }
  0xf0   : > { %520 = vadd.xlane.f32.xlu0 %v519_v9 }
 0x175   : > { %v524_v10 = vpop.xlane.xlu0 %523 }
 0x176   : > { %v528_v11 = vmax.f32 %v524_v10, 1e-12  ;;  %vm526_vm2 = vcmp.gt.f32.partialorder %v524_v10, 0.0 }
 0x178   : > { %1687 = vrsqrt.f32 %v528_v11 }
 0x179   : > { %v521_v12 = vpop.xlane.xlu0 %520 }
 0x17a   : > { %v527_v13 = vmax.f32 %v521_v12, 1e-12  ;;  %vm525_vm3 = vcmp.gt.f32.partialorder %v521_v12, 0.0 }
 0x17c   : > { %1689 = vrsqrt.f32 %v527_v13 }
 0x185   : > { %v1688_v14 = vpop.eup %1687 }
 0x186   : > { %v532_v15 = vsel %vm526_vm2, %v1688_v14, 0.0 }
 0x187   : > { %1587 = vmatprep.subr.msk.mxu1 %vm434_vm0, %v532_v15 }
 0x188   : > { %1588 = vmatpush3.xpose.msk.msra.mxu1 %vm434_vm0, %v532_v15 }
 0x189   : > { %v1690_v16 = vpop.eup %1689 }
 0x18a   : > { %v531_v17 = vsel %vm525_vm3, %v1690_v16, 0.0 }
 0x18b   : > { %1589 = vmatprep.subr.msk.mxu1 %vm434_vm0, %v531_v17  ;;  %1591 = vmatprep.mubr.msk.f32.mxu1 %vm434_vm0, %v531_v17 }
 0x18c   : > { %1590 = vmatpush3.xpose.msk.msra.mxu1 %vm434_vm0, %v531_v17 }
 0x18d   : > { %1594 = vmatprep.subr.mxu1 %v430_v18 }
 0x18f   : > { %1592 = vmatmul.mubr.msk.f32.vlgmr.msra.gmra.mxu1 %vm434_vm0, %v532_v15 }
 0x190   : > { %1595 = vmatpush3.msra.mxu1 %v430_v18  ;;  %1596 = vmatprep.mubr.msk.f32.mxu1 %vm616_vm4, %v426_v19 }
 0x193   : > { %1597 = vmatmul.mubr.msk.f32.vlgmr.msra.gmra.mxu1 %vm616_vm4, %v427_v20 }
 0x24f   : > { %v1593_v22 = vpop.f32.mrf.mxu1 }
 0x250   : > { %v615_v27 = vmul.f32 %v1593_v22, %v517_v5 }
 0x251   : > { %v605_v23 = vpop.f32.mrf.mxu1 }
 0x252   : > { %v614_v24 = vmul.f32 %v605_v23, %v516_v7 }
 0x253   : > { %v1598_v25 = vpop.f32.mrf.mxu1 }
 0x254   : > { %1599 = vmatprep.subr.mxu1 %v1598_v25  ;;  %1603 = vmatprep.mubr.msk.f32.mxu1 %vm518_vm1, %v614_v24 }
 0x255   : > { %v689_v26 = vpop.f32.mrf.mxu1  ;;  %1600 = vmatpush3.msra.mxu1 %v1598_v25 }
 0x256   : > { %1601 = vmatprep.subr.mxu1 %v689_v26 }
 0x257   : > { %1602 = vmatpush3.msra.mxu1 %v689_v26 }
 0x258   : > { %1604 = vmatmul.mubr.msk.f32.vlgmr.msra.gmra.mxu1 %vm518_vm1, %v615_v27 }
 0x259   : > { %1615 = vmatprep.mubr.msk.f32.mxu1 %vm434_vm0, %v1816_v40 }
 0x318   : > { %v1605_v31 = vpop.f32.mrf.mxu1 }
 0x319   : > { %v782_v32 = vadd.f32 %v1605_v31, %v1517_v29 }
 0x31a   : > { %v776_v33 = vpop.f32.mrf.mxu1 }
 0x31b   : > { %v777_v34 = vadd.f32 %v1517_v29, %v776_v33  ;;  %v786_v35 = vmax.f32 %v782_v32, 0.0 }
 0x31d   : > { %v785_v36 = vmax.f32 %v777_v34, 0.0  ;;  %v1997_v39 = vmul.f32 %v793_v37, %v786_v35 }
 0x31f   : > { %v1995_v38 = vmul.f32 %v789_v30, %v785_v36 }
 0x321   : > { %1608 = vmatprep.mubr.msk.f32.mxu0 %vm616_vm4, %v1995_v38 }
 0x322   : > { %1609 = vmatmul.mubr.msk.f32.vlgmr.msra.gmra.mxu0 %vm616_vm4, %v1997_v39 }
 0x323   : > { %1619 = vmatpush3.msra.mxu0 %v433_v59 }
 0x3e2   : > { %v1610_v41 = vpop.f32.mrf.mxu0 }
 0x3e3   : > { %v881_v42 = vsel %vm879_vm5, %v1610_v41, -1e+30 }
 0x3e4   : > { %976 = vperm.xlu1 %1685, %v881_v42   ;;  %v869_v43 = vpop.f32.mrf.mxu0  ;;  %1611 = vmatprep.subr.msk.mxu1 %vm434_vm0, %v881_v42 }
 0x3e5   : > { %v880_v44 = vsel %vm878_vm6, %v869_v43, -1e+30  ;;  %1612 = vmatpush3.xpose.msk.msra.mxu1 %vm434_vm0, %v881_v42 }
 0x3e6   : > { %1691 = vtanh.f32 %v880_v44  ;;  %972 = vperm.xlu0 %1686, %v880_v44   ;;  %1613 = vmatprep.subr.msk.mxu1 %vm434_vm0, %v880_v44 }
 0x3e7   : > { %1693 = vtanh.f32 %v881_v42 }
 0x3e9   : > { %1614 = vmatpush3.xpose.msk.msra.mxu1 %vm434_vm0, %v880_v44 }
 0x3ec   : > { %1616 = vmatmul.mubr.msk.f32.vlgmr.msra.gmra.mxu1 %vm434_vm0, %v1816_v40 }
 0x3f3   : > { %v1692_v45 = vpop.eup %1691 }
 0x3f4   : > { %1009 = vperm.xlu0 %1686, %v1692_v45   ;;  %v1694_v60 = vpop.eup %1693 }
 0x45f   : > { %v977_v50 = vpop.permute.xlu1 %976 }
 0x461   : > { %v973_v52 = vpop.permute.xlu0 %972 }
 0x46f   : > { %v1010_v18 = vpop.permute.xlu0 %1009 }
 0x470   : > { %v1017_v19 = vmul.f32 %v1010_v18, %v1995_v38 }
 0x4ac   : > { %v1617_v51 = vpop.f32.mrf.mxu1 }
 0x4ad   : > { %vm980_vm8 = vcmp.gt.f32.partialorder %v977_v50, %v1617_v51  ;;  %vm982_vm9 = vcmp.eq.f32.partialorder %v977_v50, %v1617_v51 }
 0x4ae   : > { %vm986_vm11 = vmand %vm982_vm9, %vm984_vm7  ;;  %v957_v53 = vpop.f32.mrf.mxu1  ;;  %vm1197_vm9 = vcmask 31744  }
 0x4af   : > { %vm979_vm12 = vcmp.gt.f32.partialorder %v973_v52, %v957_v53  ;;  %vm981_vm13 = vcmp.eq.f32.partialorder %v973_v52, %v957_v53  ;;  %vm988_vm14 = vmor %vm980_vm8, %vm986_vm11 }
 0x4b0   : > { %vm985_vm15 = vmand %vm981_vm13, %vm983_vm10  ;;  %v1527_v57 = vsel %vm988_vm14, 1.0, %v1817_v54 }
 0x4b1   : > { %vm987_vm2 = vmor %vm979_vm12, %vm985_vm15  ;;  %v996_v58 = vsel %vm518_vm1, %v1527_v57, 0.0 }
 0x4b2   : > { %v1526_v55 = vsel %vm987_vm2, 1.0, %v1817_v54 }
 0x4b3   : > { %v993_v56 = vsel %vm518_vm1, %v1526_v55, 0.0 }
 0x4b4   : > { %994 = vadd.xlane.f32.xlu1 %v993_v56 }
 0x4b8   : > { %997 = vadd.xlane.f32.xlu1 %v996_v58 }
 0x4c9   : > { %1014 = vperm.xlu1 %1685, %v1694_v60  }
 0x53d   : > { %v995_v61 = vpop.xlane.xlu1 %994 }
 0x53e   : > { %v999_v62 = vsub.f32 15.0, %v995_v61 }
 0x540   : > { %vm1001_vm3 = vcmp.lt.f32.partialorder %v999_v62, 2.0 }
 0x541   : > { %v1003_v63 = vsel %vm1001_vm3, %v1942_v1, 0.0  ;;  %v998_v3 = vpop.xlane.xlu1 %997 }
 0x542   : > { %v1000_v5 = vsub.f32 15.0, %v998_v3  ;;  %1021 = vperm.xlu0 %1686, %v1003_v63   ;;  %1200 = vst.msk [vmem:[%s2023_s29] sm:$0xff] %vm434_vm0, %v1003_v63  ;;  %vm1228_vm6 = vcmp.gt.f32.partialorder %v1003_v63, 0.0  ;;  %v1202_v7 = vsel %vm434_vm0, %v1003_v63, 0.0 }
 0x543   : > { %v1230_v9 = vsel %vm1228_vm6, 1, %v1815_v21 }
 0x544   : > { %vm1002_vm5 = vcmp.lt.f32.partialorder %v1000_v5, 2.0 }
 0x545   : > { %v1004_v6 = vsel %vm1002_vm5, %v1940_v0, 0.0  ;;  %v1015_v20 = vpop.permute.xlu1 %1014 }
 0x546   : > { %1026 = vperm.xlu0 %1686, %v1004_v6   ;;  %1623 = vmatprep.subr.msk.mxu0 %vm434_vm0, %v1004_v6  ;;  %v1203_v1 = vsel %vm434_vm0, %v1004_v6, 0.0  ;;  %1201 = vst.msk [vmem:[%s2023_s29 + $0x8] sm:$0xff] %vm434_vm0, %v1004_v6  ;;  %vm1229_vm7 = vcmp.gt.f32.partialorder %v1004_v6, 0.0  ;;  %v1018_v24 = vmul.f32 %v1015_v20, %v1997_v39 }
 0x547   : > { %v1204_v8 = vadd.f32 %v1203_v1, %v1202_v7  ;;  %v1231_v12 = vsel %vm1229_vm7, 1, %v1815_v21 }
 0x549   : > { %v1205_v10 = vrot.slane %v1204_v8, 4 }
 0x54a   : > { %1233 = vperm.xlu0 %1686, %v1230_v9  }
 0x54b   : > { %v1206_v11 = vadd.f32 %v1205_v10, %v1204_v8 }
 0x54d   : > { %v1207_v0 = vrot.slane %v1206_v11, 2 }
 0x54e   : > { %1236 = vperm.xlu0 %1686, %v1231_v12  }
 0x54f   : > { %v1208_v13 = vadd.f32 %v1207_v0, %v1206_v11 }
 0x551   : > { %v1209_v14 = vrot.slane %v1208_v13, 1 }
 0x553   : > { %v1210_v15 = vadd.f32 %v1209_v14, %v1208_v13 }
 0x555   : > { %vm1251_vm8 = vcmp.gt.f32.partialorder %v1210_v15, 0.0  ;;  %v1220_v16 = vmax.f32 %v1210_v15, 1.0 }
 0x556   : > { %v1252_v17 = vsel %vm1251_vm8, 1, %v1815_v21 }
 0x557   : > { %1254 = vperm.xlu1 %1685, %v1252_v17   ;;  %1223 = vperm.xlu0 %1686, %v1220_v16  }
 0x5bd   : > { %v1022_v22 = vpop.permute.xlu0 %1021 }
 0x5be   : > { %v1029_v23 = vmul.f32 %v1022_v22, %v1017_v19 }
 0x5c0   : > { %1620 = vmatprep.mubr.msk.f32.mxu0 %vm616_vm4, %v1029_v23 }
 0x5c1   : > { %v1027_v25 = vpop.permute.xlu0 %1026 }
 0x5c2   : > { %v1030_v26 = vmul.f32 %v1027_v25, %v1018_v24 }
 0x5c4   : > { %1621 = vmatmul.mubr.msk.f32.vlgmr.msra.gmra.mxu0 %vm616_vm4, %v1030_v26 }
 0x5c5   : > { %1624 = vmatpush3.xpose.msk.msra.mxu0 %vm434_vm0, %v1004_v6  ;;  %1627 = vmatprep.mubr.msk.f32.mxu0 %vm434_vm0, %v1003_v63  ;;  %v1234_v21 = vpop.permute.xlu0 %1233 }
 0x5c6   : > { %1625 = vmatprep.subr.msk.mxu0 %vm434_vm0, %v1003_v63 }
 0x5c9   : > { %1626 = vmatpush3.xpose.msk.msra.mxu0 %vm434_vm0, %v1003_v63  ;;  %v1237_v27 = vpop.permute.xlu0 %1236 }
 0x5ca   : > { %vm1239_vm10 = vcmp.eq.s32.totalorder %v1237_v27, 1 }
 0x5cc   : > { %1628 = vmatmul.mubr.msk.f32.vlgmr.msra.gmra.mxu0 %vm434_vm0, %v1004_v6  ;;  %vm1238_vm0 = vcmp.eq.s32.totalorder %v1234_v21, 1 }
 0x5d2   : > { %v1224_v31 = vpop.permute.xlu0 %1223 }
 0x5d3   : > { %1695 = vrcp.f32 %v1224_v31 }
 0x684   : > { %v1622_v28 = vpop.f32.mrf.mxu0 }
 0x685   : > { %v1113_v29 = vmul.f32 %v1622_v28, %v1027_v25 }
 0x686   : > { %v1103_v30 = vpop.f32.mrf.mxu0 }
 0x687   : > { %1199 = vst.msk [vmem:[%s393_s26 + $0x8] sm:$0xff] %vm1197_vm9, %v1113_v29  ;;  %v1241_v32 = vsel %vm1239_vm10, %v1113_v29, -1e+30  ;;  %v1112_v33 = vmul.f32 %v1103_v30, %v1022_v22  ;;  %v1212_v34 = vsel %vm1197_vm9, %v1113_v29, 0.0 }
 0x688   : > { %v1243_v37 = vsel %vm1197_vm9, %v1241_v32, -inf }
 0x689   : > { %1198 = vst.msk [vmem:[%s393_s26] sm:$0xff] %vm1197_vm9, %v1112_v33  ;;  %v1211_v35 = vsel %vm1197_vm9, %v1112_v33, 0.0  ;;  %v1240_v36 = vsel %vm1238_vm0, %v1112_v33, -1e+30 }
 0x68a   : > { %v1213_v38 = vadd.f32 %v1212_v34, %v1211_v35  ;;  %v1242_v39 = vsel %vm1197_vm9, %v1240_v36, -inf }
 0x68b   : > { %v1244_v40 = vmax.f32 %v1242_v39, %v1243_v37 }
 0x68c   : > { %v1214_v41 = vrot.slane %v1213_v38, 4  ;;  %v1629_v42 = vpop.f32.mrf.mxu0 }
 0x68d   : > { %v1245_v43 = vrot.slane %v1244_v40, 4  ;;  %v1194_v44 = vmul.f32 %v1629_v42, %v1960_v2 }
 0x68e   : > { %v1215_v45 = vadd.f32 %v1214_v41, %v1213_v38  ;;  %v1184_v46 = vpop.f32.mrf.mxu0 }
 0x68f   : > { %1710 = shalt.err (!%p1707_p3)
}
 0x690   : > { %s1711_s21 = scalar_lea.hbm %s2072_s18, 256  ;;  %s1715_s17 = scalar_lea.hbm %s2197_s8, 512 }
 0x691   : > { %p1712_p4 = scmp.ne.s32.totalorder %s2072_s18, %s1711_s21  ;;  %p1716_p9 = scmp.lt.s32.totalorder %s2072_s18, %s2197_s8 }
 0x692   : > { %p1717_p10 = scmp.lt.s32.totalorder %s1715_s17, %s1711_s21 }
 0x693   : > { %p1713_p7 = pnand %p1712_p4, %p1919_p5 }
 0x694   : > { %p1718_p11 = por %p1717_p10, %p1716_p9 }
 0x695   : > { %p1714_p8 = pneg %p1713_p7 }
 0x697   : > { %p1719_p12 = pnand %p1718_p11, %p1714_p8 }
 0x699   : > { %1722 = shalt.err (!%p1719_p12)
}
 0x69a   : > { %s2202_s0 = smov 128   ;;  %s1820_s1 = smov 8   ;;  %1196 = vst.msk [vmem:[%s2049_s12 + $0x8] sm:$0xff] %vm518_vm1, %v1194_v44  ;;  %v1193_v2 = vmul.f32 %v1184_v46, %v1962_v4  ;;  %v1246_v47 = vmax.f32 %v1244_v40, %v1245_v43  ;;  %v1216_v48 = vrot.slane %v1215_v45, 2 }
 0x69b   : > { %1631 = dma.vmem_to_hbm [thread:$0]  (%p1919_p5), %s2053_s30, 256, %s2072_s18, %s2074_s27, %s2202_s0, %s2202_s0, %s1820_s1  }
 0x69c   : > { %s2107_s4 = scalar_lea.hbm %s2196_s7, %s2065_s28  ;;  %s2113_s26 = scalar_lea.hbm %s2198_s9, %s2065_s28 }
 0x69d   : > { %s1723_s17 = scalar_lea.vmem %s2058_s11, 256  ;;  %s1821_s18 = smov [#allocation6]  }
 0x69e   : > { %p1724_p13 = scmp.ne.s32.totalorder %s2058_s11, %s1723_s17  ;;  %s1727_s30 = sshll.u32 %s1821_s18, 4  ;;  %s1728_s30 = int_to_ptr.vmem [resolvable:$false] %s1727_s30 }
 0x69f   : > { %s1729_s0 = scalar_lea.vmem %s1728_s30, 512  ;;  %p1730_p2 = scmp.lt.s32.totalorder %s2058_s11, %s1728_s30 }
 0x6a0   : > { %p1725_p0 = pnand %p1724_p13, %p1919_p5  ;;  %p1731_p3 = scmp.lt.s32.totalorder %s1729_s0, %s1723_s17 }
 0x6a2   : > { %p1726_p1 = pneg %p1725_p0  ;;  %p1732_p4 = por %p1731_p3, %p1730_p2 }
 0x6a4   : > { %p1733_p7 = pnand %p1732_p4, %p1726_p1 }
 0x6a6   : > { %1736 = shalt.err (!%p1733_p7)
}
 0x6a7   : > { %s1737_s28 = scalar_lea.hbm %s2113_s26, 256  ;;  %s1741_s21 = scalar_lea.hbm %s2198_s9, 512 }
 0x6a8   : > { %p1738_p8 = scmp.ne.s32.totalorder %s2113_s26, %s1737_s28  ;;  %p1742_p11 = scmp.lt.s32.totalorder %s2113_s26, %s2198_s9 }
 0x6a9   : > { %p1743_p12 = scmp.lt.s32.totalorder %s1741_s21, %s1737_s28 }
 0x6aa   : > { %p1739_p9 = pnand %p1738_p8, %p1919_p5 }
 0x6ab   : > { %p1744_p13 = por %p1743_p12, %p1742_p11 }
 0x6ac   : > { %p1740_p10 = pneg %p1739_p9 }
 0x6ae   : > { %p1745_p0 = pnand %p1744_p13, %p1740_p10 }
 0x6b0   : > { %1748 = shalt.err (!%p1745_p0)
}
 0x6b1   : > { %s2216_s0 = smov 128   ;;  %1195 = vst.msk [vmem:[%s2049_s12] sm:$0xff] %vm518_vm1, %v1193_v2  ;;  %v1247_v4 = vrot.slane %v1246_v47, 2  ;;  %v1217_v49 = vadd.f32 %v1216_v48, %v1215_v45  ;;  %s2217_s17 = sand.u32 1, %s1805_s14  }
 0x6b2   : > { %1632 = dma.vmem_to_hbm [thread:$0]  (%p1919_p5), %s2058_s11, 256, %s2113_s26, %s2074_s27, %s2216_s0, %s2216_s0, %s1820_s1  }
 0x6b3   : > { %s1267_s30 = scalar_lea.sflag [#allocation3], %s2217_s17  ;;  %s1749_s28 = scalar_lea.vmem %s2061_s20, 256 }
 0x6b4   : > { %p1750_p1 = scmp.ne.s32.totalorder %s2061_s20, %s1749_s28  ;;  %s1822_s2 = smov [#allocation2]  }
 0x6b5   : > { %s1753_s3 = sshll.u32 %s1822_s2, 4  ;;  %s1754_s3 = int_to_ptr.vmem [resolvable:$false] %s1753_s3 }
 0x6b6   : > { %p1751_p2 = pnand %p1750_p1, %p1919_p5  ;;  %s1755_s21 = scalar_lea.vmem %s1754_s3, 512 }
 0x6b7   : > { %p1756_p4 = scmp.lt.s32.totalorder %s2061_s20, %s1754_s3  ;;  %p1757_p7 = scmp.lt.s32.totalorder %s1755_s21, %s1749_s28 }
 0x6b8   : > { %p1752_p3 = pneg %p1751_p2 }
 0x6b9   : > { %p1758_p8 = por %p1757_p7, %p1756_p4 }
 0x6bb   : > { %p1759_p9 = pnand %p1758_p8, %p1752_p3 }
 0x6bd   : > { %1762 = shalt.err (!%p1759_p9)
}
 0x6be   : > { %s1763_s27 = scalar_lea.hbm %s2107_s4, 256  ;;  %s1767_s26 = scalar_lea.hbm %s2196_s7, 512 }
 0x6bf   : > { %p1764_p10 = scmp.ne.s32.totalorder %s2107_s4, %s1763_s27  ;;  %p1768_p13 = scmp.lt.s32.totalorder %s2107_s4, %s2196_s7 }
 0x6c0   : > { %p1769_p0 = scmp.lt.s32.totalorder %s1767_s26, %s1763_s27 }
 0x6c1   : > { %p1765_p11 = pnand %p1764_p10, %p1919_p5 }
 0x6c2   : > { %p1770_p1 = por %p1769_p0, %p1768_p13 }
 0x6c3   : > { %p1766_p12 = pneg %p1765_p11 }
 0x6c5   : > { %p1771_p2 = pnand %p1770_p1, %p1766_p12 }
 0x6c7   : > { %1774 = shalt.err (!%p1771_p2)
}
 0x6c8   : > { %1630 = dma.vmem_to_hbm [thread:$0]  (%p1919_p5), %s2061_s20, 256, %s2107_s4, %s1267_s30, %s2216_s0, %s2216_s0, %s1820_s1   ;;  %v1248_v50 = vmax.f32 %v1246_v47, %v1247_v4  ;;  %v1218_v51 = vrot.slane %v1217_v49, 1  ;;  %v1255_v52 = vpop.permute.xlu1 %1254  ;;  %v1696_v55 = vpop.eup %1695  ;;  %vm1258_vm1 = vcmask 24576   ;;  %vm1264_vm11 = vcmask 57376  }
 0x6c9   : > { %s423_s2 = scalar_lea.vmem %s2199_s10, %s1931_s25  ;;  %vm1256_vm4 = vcmp.eq.s32.totalorder %v1255_v52, 1  ;;  %s1823_s23 = smov 4  }
 0x6ca   : > { %v1249_v53 = vrot.slane %v1248_v50, 1  ;;  %v1219_v54 = vadd.f32 %v1218_v51, %v1217_v49 }
 0x6cc   : > { %v1250_v56 = vmax.f32 %v1248_v50, %v1249_v53  ;;  %v1227_v57 = vmul.f32 %v1696_v55, %v1219_v54 }
 0x6ce   : > { %v1257_v58 = vsel %vm1256_vm4, %v1250_v56, 0.0  ;;  %1259 = vst.msk [vmem:[%s423_s2] sm:$0x1] %vm1258_vm1, %v1227_v57 }
 0x6cf   : > { %1261 = vrot.lane.b32.xlu1 %v1257_v58, %s1823_s23 }
 0x741   : > { %v1262_v59 = vpop.permute.xlu1 %1261 }
 0x742   : > { %1265 = vst.msk [vmem:[%s423_s2] sm:$0x1] %vm1264_vm11, %v1262_v59 }
 0x743 PF: > { %p1646_p5 = scmp.ge.s32.totalorder %s1813_s16, 2  ;;  %s1343_s20 = sand.u32 1, %s1801_s13  }
 0x744   : > { %s1344_s25 = scalar_lea.sflag [#allocation3], %s1343_s20 }
 0x745   : > { %p1637_p3 = pnand %p1646_p5, %p1923_p6 }
 0x747   : > { %p1638_p4 = pneg %p1637_p3 }
 0x749   : > { %1792 = dma.done.wait (%p1638_p4), %s1344_s25, 256  }
 0x74a   : > { %1794 = vsyncadd (%p1638_p4), %s1344_s25, 4294967040  ;;  %s2218_s1 = sadd.s32 4294967294, %s1813_s16  }
 0x74b   : > { %s1352_s4 = sand.u32 1, %s2218_s1  }
 0x74c   : > { %s1353_s0 = scalar_lea.sflag [#allocation5], %s1352_s4 }
 0x74d   : > { %1796 = dma.done.wait (%p1638_p4), %s1353_s0, 512  }
 0x74e   : > { %1798 = vsyncadd (%p1638_p4), %s1353_s0, 4294966784  ;;  %p24_p7 = scmp.ge.s32.totalorder %s1904_s19, 4   ;;  %s2219_s13 = smov %s1805_s14 }
 0x74f   : > { %s2220_s14 = smov %s1809_s15  ;;  %s2221_s15 = smov %s1917_s22 }
 0x750   : > { %s2222_s16 = smov %s1904_s19  ;;  %26 = sbr.rel (!%p24_p7) target bundleno = 11 (0xb), region = 133 }
 0x755   :  { %1373 = vsyncpa [#allocation3], 1 }
 0x756   :  { %1375 = vsyncpa [#allocation3 + $0x1], 1 }
 0x757   :  { %1376 = vsyncpa [#allocation5], 1 }
 0x758   :  { %1378 = vsyncpa [#allocation5 + $0x1], 1 }

</bundles_post_ra>
